<compile_context>
chip_gen: v5e
topology: v5e:2x2
jax: 0.10.0
libtpu: 0.0.40
codegen_flags: <defaults>
</compile_context>

<pallas_src>
import math

import jax
import jax.numpy as jnp
from jax import lax
from jax.experimental import pallas as pl
from jax.experimental.pallas import tpu as pltpu

# ----------------------------- config (small) --------------------------------
VOCAB = 50
B = 2               # batch
S = 8               # sequence length
H = 32              # hidden size (= model_l2.clf.in_features)
NH = 4              # attention heads
HD = H // NH        # head dim
FF = 4 * H          # FFN intermediate (=128)
N_LAYERS = 2
N_CLASS_L1 = 3      # config['n_class_l1']
N_CLASS_L2 = 5      # config['n_class']
LN_EPS = 1e-12

assert HD & (HD - 1) == 0 and S & (S - 1) == 0
_HD_SHIFT = HD.bit_length() - 1
_S_SHIFT = S.bit_length() - 1
assert 3 * H <= 128 and FF <= 128 and H <= 128

# ---- packed per-layer bf16 weight slab layout: (N_LAYERS, LROWS, 128) -------
QKV_R0 = 0                       # rows [0, H) weight, row H bias ; cols [0, 3H)
WO_R0 = QKV_R0 + H + 1           # (H, H) + bias row              ; cols [0, H)
W1_R0 = WO_R0 + H + 1            # (H, FF) + bias row             ; cols [0, FF)
W2_R0 = W1_R0 + H + 1            # (FF, H) + bias row             ; cols [0, H)
LROWS = ((W2_R0 + FF + 1 + 7) // 8) * 8

# ---- packed misc f32 slab layout: (MROWS, 128) -------------------------------
POS_R0 = 0                       # (S, H) positional embeddings
EMBLN_R0 = POS_R0 + S            # row: gamma, row+1: beta
LN_R0 = EMBLN_R0 + 2             # 4 rows per layer: [g1, b1, g2, b2]
POOL_R0 = LN_R0 + 4 * N_LAYERS   # (H, H) pooler weight + bias row
HEADS_R0 = POOL_R0 + H + 1       # (H, 128) padded [.. | W_l1 | W_l2 | 0..] + bias row
CLF_R0 = HEADS_R0 + H + 1        # (128, 128) padded clf weight + bias row
MROWS = ((CLF_R0 + 128 + 1 + 7) // 8) * 8

# lane layout of the packed output row: [final logits | l1 logits | l2 logits]
OUT_LOG_LO, OUT_LOG_HI = 0, N_CLASS_L2
OUT_L1_LO, OUT_L1_HI = OUT_LOG_HI, OUT_LOG_HI + N_CLASS_L1
OUT_L2_LO, OUT_L2_HI = OUT_L1_HI, OUT_L1_HI + N_CLASS_L2
assert OUT_L2_HI <= 128
OUT_SUBLANES, OUT_LANES = 8, 128


def _ln(x, gamma, beta):
    mu = jnp.mean(x, axis=-1, keepdims=True)
    var = jnp.mean((x - mu) ** 2, axis=-1, keepdims=True)
    return (x - mu) * lax.rsqrt(var + LN_EPS) * gamma + beta


def _fold_qscale(w_qkv, b_qkv):
    # fold the 1/sqrt(HD) attention scale into the Q columns (weight + bias)
    scale = 1.0 / math.sqrt(HD)
    col_scale = jnp.concatenate(
        [jnp.full((H,), scale, jnp.float32), jnp.ones((2 * H,), jnp.float32)])
    return w_qkv * col_scale[None, :], b_qkv * col_scale


# ------------------------- the single fused kernel ----------------------------
def e2e_bibert_kernel(x_ref, lw_ref, misc_ref, out_ref):
    f32, bf16 = jnp.float32, jnp.bfloat16

    # ---- constant masks (built once; XLU/VPU-cheap iota compares) -----------
    # val_mask[h*S + s, c] = 1  iff column c belongs to head h
    ri = lax.broadcasted_iota(jnp.int32, (NH * S, H), 0)
    ci = lax.broadcasted_iota(jnp.int32, (NH * S, H), 1)
    val_mask = (jnp.right_shift(ri, _S_SHIFT)
                == jnp.right_shift(ci, _HD_SHIFT)).astype(f32)
    # collapse[s, h*S + t] = 1 iff t == s   (folds per-head row blocks back)
    ri2 = lax.broadcasted_iota(jnp.int32, (S, NH * S), 0)
    ci2 = lax.broadcasted_iota(jnp.int32, (S, NH * S), 1)
    collapse = (jnp.bitwise_and(ci2, S - 1) == ri2).astype(f32)

    # ---- embeddings: gathered token emb (from XLA) + pos emb + LN -----------
    x = x_ref[0]                                               # (S, H) f32
    x = x + misc_ref[POS_R0:POS_R0 + S, 0:H]
    x = _ln(x,
            misc_ref[EMBLN_R0:EMBLN_R0 + 1, 0:H],
            misc_ref[EMBLN_R0 + 1:EMBLN_R0 + 2, 0:H])

    # ---- encoder layers (static unroll; switch to a grid axis / fori_loop ----
    # ---- when N_LAYERS grows beyond ~4) --------------------------------------
    nt_dims = (((1,), (1,)), ((), ()))          # A @ B.T (contract last dims)
    for l in range(N_LAYERS):
        x_bf = x.astype(bf16)

        # fused QKV projection (bf16 operands, f32 accumulate)
        wqkv = lw_ref[l, QKV_R0:QKV_R0 + H, 0:3 * H]                   # bf16
        bqkv = lw_ref[l, QKV_R0 + H:QKV_R0 + H + 1, 0:3 * H].astype(f32)
        qkv = jnp.dot(x_bf, wqkv, preferred_element_type=f32) + bqkv   # (S, 3H)
        q, k, v = qkv[:, 0:H], qkv[:, H:2 * H], qkv[:, 2 * H:3 * H]

        # all heads at once: one sublane replication of q per layer, then
        # block-diagonal masking.  Each score row = one (head, query) pair.
        # TODO(synk): no padding/attention mask applied (no pad tokens here).
        q_bd = (jnp.concatenate([q] * NH, axis=0) * val_mask).astype(bf16)
        s = lax.dot_general(q_bd, k.astype(bf16), nt_dims,
                            preferred_element_type=f32)                # (NH*S, S)
        s = s - jnp.max(s, axis=-1, keepdims=True)      # per-(head,query) max
        p = jnp.exp(s)
        p = p * pl.reciprocal(jnp.sum(p, axis=-1, keepdims=True), approx=True)
        ctx_rows = jnp.dot(p.astype(bf16), v.astype(bf16),
                           preferred_element_type=f32)                 # (NH*S, H)
        ctx = jnp.dot(collapse, ctx_rows * val_mask,
                      preferred_element_type=f32)                      # (S, H)

        wo = lw_ref[l, WO_R0:WO_R0 + H, 0:H]
        bo = lw_ref[l, WO_R0 + H:WO_R0 + H + 1, 0:H].astype(f32)
        attn = jnp.dot(ctx.astype(bf16), wo, preferred_element_type=f32) + bo

        g1 = misc_ref[LN_R0 + 4 * l + 0:LN_R0 + 4 * l + 1, 0:H]
        b1 = misc_ref[LN_R0 + 4 * l + 1:LN_R0 + 4 * l + 2, 0:H]
        g2 = misc_ref[LN_R0 + 4 * l + 2:LN_R0 + 4 * l + 3, 0:H]
        b2 = misc_ref[LN_R0 + 4 * l + 3:LN_R0 + 4 * l + 4, 0:H]
        x = _ln(x + attn, g1, b1)

        w1 = lw_ref[l, W1_R0:W1_R0 + H, 0:FF]
        bb1 = lw_ref[l, W1_R0 + H:W1_R0 + H + 1, 0:FF].astype(f32)
        h1 = jnp.dot(x.astype(bf16), w1, preferred_element_type=f32) + bb1
        # TODO(synk): PyTorch BERT uses exact (erf) GELU; tanh approx used here.
        h1 = jax.nn.gelu(h1, approximate=True)
        w2 = lw_ref[l, W2_R0:W2_R0 + FF, 0:H]
        bb2 = lw_ref[l, W2_R0 + FF:W2_R0 + FF + 1, 0:H].astype(f32)
        h2 = jnp.dot(h1.astype(bf16), w2, preferred_element_type=f32) + bb2
        x = _ln(x + h2, g2, b2)

    # ---- pooler + classification heads (lane-padded, f32) --------------------
    # computed for all S rows so the final store is one dense (8,128) tile;
    # only row 0 ([CLS]) is meaningful and is sliced out by the wrapper.
    # TODO(synk): dropout on the pooled embedding is identity (eval mode).
    wpool = misc_ref[POOL_R0:POOL_R0 + H, 0:H]
    bpool = misc_ref[POOL_R0 + H:POOL_R0 + H + 1, 0:H]
    pooled = jnp.tanh(jnp.dot(x, wpool, preferred_element_type=f32) + bpool)

    wheads = misc_ref[HEADS_R0:HEADS_R0 + H, :]            # (H, 128), cols 5..12 live
    bheads = misc_ref[HEADS_R0 + H:HEADS_R0 + H + 1, :]
    l1l2_pad = jnp.dot(pooled, wheads, preferred_element_type=f32) + bheads

    wclf = misc_ref[CLF_R0:CLF_R0 + 128, :]                # (128, 128), rows 5..12 live
    bclf = misc_ref[CLF_R0 + 128:CLF_R0 + 129, :]
    logits_pad = jnp.dot(l1l2_pad, wclf, preferred_element_type=f32) + bclf

    # packed lane-dense output row: [logits | l1 | l2 | zeros]
    out_ref[0] = (logits_pad + l1l2_pad).astype(out_ref.dtype)


# ------------------------------- wrapper --------------------------------------
def _fused_forward(packed, input_ids):
    # token-embedding gather done by XLA (review: avoid one-hot matmul in kernel)
    x_emb = jnp.take(packed['tok_emb'],
                     input_ids.reshape(-1).astype(jnp.int32),
                     axis=0).reshape(B, S, H)
    out = pl.pallas_call(
        e2e_bibert_kernel,
        out_shape=jax.ShapeDtypeStruct((B, OUT_SUBLANES, OUT_LANES), jnp.float32),
        grid=(B,),
        in_specs=[
            pl.BlockSpec((1, S, H), lambda b: (b, 0, 0)),
            pl.BlockSpec((N_LAYERS, LROWS, 128), lambda b: (0, 0, 0)),
            pl.BlockSpec((MROWS, 128), lambda b: (0, 0)),
        ],
        out_specs=pl.BlockSpec((1, OUT_SUBLANES, OUT_LANES), lambda b: (b, 0, 0)),
        compiler_params=pltpu.CompilerParams(
            dimension_semantics=("parallel",)),
    )(x_emb, packed['layers'], packed['misc'])
    row = out[:, 0, :]
    logits = row[:, OUT_LOG_LO:OUT_LOG_HI]
    l1_logits = row[:, OUT_L1_LO:OUT_L1_HI]
    l2_logits = row[:, OUT_L2_LO:OUT_L2_HI]
    return logits, l1_logits, l2_logits


_fused_forward_jit = jax.jit(_fused_forward)


def forward(packed, input_ids, label_l1, label_l2, inference=False):
    logits, l1_logits, l2_logits = _fused_forward_jit(packed, input_ids)
    if not inference:
        return (logits, l1_logits, l2_logits, label_l1, label_l2)
    return (logits, label_l2)


# ------------------------------- parameters -----------------------------------
def init_params(key):
    keys = iter(jax.random.split(key, 64))

    def w(shape):
        return 0.02 * jax.random.normal(next(keys), shape, jnp.float32)

    p = {
        'tok_emb': w((VOCAB, H)),
        'pos_emb': w((S, H)),
        'emb_ln_g': jnp.ones((H,), jnp.float32),
        'emb_ln_b': jnp.zeros((H,), jnp.float32),
        'w_pool': w((H, H)), 'b_pool': w((H,)),
        'w_l1': w((H, N_CLASS_L1)), 'b_l1': w((N_CLASS_L1,)),
        'w_l2': w((H, N_CLASS_L2)), 'b_l2': w((N_CLASS_L2,)),
        'w_clf': w((N_CLASS_L1 + N_CLASS_L2, N_CLASS_L2)), 'b_clf': w((N_CLASS_L2,)),
        'layers': [],
    }
    for _ in range(N_LAYERS):
        p['layers'].append({
            'w_qkv': w((H, 3 * H)), 'b_qkv': w((3 * H,)),
            'w_o': w((H, H)), 'b_o': w((H,)),
            'w_ffn1': w((H, FF)), 'b_ffn1': w((FF,)),
            'w_ffn2': w((FF, H)), 'b_ffn2': w((H,)),
            'ln1_g': jnp.ones((H,), jnp.float32), 'ln1_b': jnp.zeros((H,), jnp.float32),
            'ln2_g': jnp.ones((H,), jnp.float32), 'ln2_b': jnp.zeros((H,), jnp.float32),
        })
    return p


def pack_params(p):
    """Pack logical params into the 2 HBM slabs + token-embedding table."""
    # per-layer bf16 matmul-weight slab
    layer_slabs = []
    for lp in p['layers']:
        slab = jnp.zeros((LROWS, 128), jnp.float32)
        wqkv, bqkv = _fold_qscale(lp['w_qkv'], lp['b_qkv'])
        slab = slab.at[QKV_R0:QKV_R0 + H, 0:3 * H].set(wqkv)
        slab = slab.at[QKV_R0 + H, 0:3 * H].set(bqkv)
        slab = slab.at[WO_R0:WO_R0 + H, 0:H].set(lp['w_o'])
        slab = slab.at[WO_R0 + H, 0:H].set(lp['b_o'])
        slab = slab.at[W1_R0:W1_R0 + H, 0:FF].set(lp['w_ffn1'])
        slab = slab.at[W1_R0 + H, 0:FF].set(lp['b_ffn1'])
        slab = slab.at[W2_R0:W2_R0 + FF, 0:H].set(lp['w_ffn2'])
        slab = slab.at[W2_R0 + FF, 0:H].set(lp['b_ffn2'])
        layer_slabs.append(slab)
    layers = jnp.stack(layer_slabs).astype(jnp.bfloat16)          # (L, LROWS, 128)

    # misc f32 slab (pos emb, LN params, pooler, lane-padded heads)
    m = jnp.zeros((MROWS, 128), jnp.float32)
    m = m.at[POS_R0:POS_R0 + S, 0:H].set(p['pos_emb'])
    m = m.at[EMBLN_R0, 0:H].set(p['emb_ln_g'])
    m = m.at[EMBLN_R0 + 1, 0:H].set(p['emb_ln_b'])
    for l, lp in enumerate(p['layers']):
        m = m.at[LN_R0 + 4 * l + 0, 0:H].set(lp['ln1_g'])
        m = m.at[LN_R0 + 4 * l + 1, 0:H].set(lp['ln1_b'])
        m = m.at[LN_R0 + 4 * l + 2, 0:H].set(lp['ln2_g'])
        m = m.at[LN_R0 + 4 * l + 3, 0:H].set(lp['ln2_b'])
    m = m.at[POOL_R0:POOL_R0 + H, 0:H].set(p['w_pool'])
    m = m.at[POOL_R0 + H, 0:H].set(p['b_pool'])
    # heads packed so the kernel output row is already [logits | l1 | l2]
    m = m.at[HEADS_R0:HEADS_R0 + H, OUT_L1_LO:OUT_L1_HI].set(p['w_l1'])
    m = m.at[HEADS_R0:HEADS_R0 + H, OUT_L2_LO:OUT_L2_HI].set(p['w_l2'])
    m = m.at[HEADS_R0 + H, OUT_L1_LO:OUT_L1_HI].set(p['b_l1'])
    m = m.at[HEADS_R0 + H, OUT_L2_LO:OUT_L2_HI].set(p['b_l2'])
    # clf(cat([l1, l2])) : picks columns [OUT_L1_LO, OUT_L2_HI) of l1l2_pad
    m = m.at[CLF_R0 + OUT_L1_LO:CLF_R0 + OUT_L2_HI,
             OUT_LOG_LO:OUT_LOG_HI].set(p['w_clf'])
    m = m.at[CLF_R0 + 128, OUT_LOG_LO:OUT_LOG_HI].set(p['b_clf'])

    return {'tok_emb': p['tok_emb'], 'layers': layers, 'misc': m}


# -------------------- pure-JAX reference (same numerics) ----------------------
def reference_forward(p, input_ids):
    f32, bf16 = jnp.float32, jnp.bfloat16
    x = jnp.take(p['tok_emb'], input_ids.reshape(-1), axis=0).reshape(B, S, H)
    x = x + p['pos_emb'][None]
    x = _ln(x, p['emb_ln_g'], p['emb_ln_b'])
    for lp in p['layers']:
        wqkv, bqkv = _fold_qscale(lp['w_qkv'], lp['b_qkv'])
        wqkv = wqkv.astype(bf16)
        bqkv = bqkv.astype(bf16).astype(f32)
        qkv = jnp.einsum('bsh,hk->bsk', x.astype(bf16), wqkv,
                         preferred_element_type=f32) + bqkv
        q, k, v = qkv[..., :H], qkv[..., H:2 * H], qkv[..., 2 * H:]
        ctx_heads = []
        for h in range(NH):
            sl = slice(h * HD, (h + 1) * HD)
            s = jnp.einsum('bqd,bkd->bqk', q[..., sl].astype(bf16),
                           k[..., sl].astype(bf16), preferred_element_type=f32)
            s = s - jnp.max(s, axis=-1, keepdims=True)
            pr = jnp.exp(s)
            pr = pr / jnp.sum(pr, axis=-1, keepdims=True)
            ctx_heads.append(jnp.einsum('bqk,bkd->bqd', pr.astype(bf16),
                                        v[..., sl].astype(bf16),
                                        preferred_element_type=f32))
        ctx = jnp.concatenate(ctx_heads, axis=-1)
        attn = jnp.einsum('bsh,hk->bsk', ctx.astype(bf16), lp['w_o'].astype(bf16),
                          preferred_element_type=f32) + lp['b_o'].astype(bf16).astype(f32)
        x = _ln(x + attn, lp['ln1_g'], lp['ln1_b'])
        h1 = jnp.einsum('bsh,hk->bsk', x.astype(bf16), lp['w_ffn1'].astype(bf16),
                        preferred_element_type=f32) + lp['b_ffn1'].astype(bf16).astype(f32)
        h1 = jax.nn.gelu(h1, approximate=True)
        h2 = jnp.einsum('bsh,hk->bsk', h1.astype(bf16), lp['w_ffn2'].astype(bf16),
                        preferred_element_type=f32) + lp['b_ffn2'].astype(bf16).astype(f32)
        x = _ln(x + h2, lp['ln2_g'], lp['ln2_b'])
    cls = x[:, 0, :]
    pooled = jnp.tanh(cls @ p['w_pool'] + p['b_pool'])
    l1 = pooled @ p['w_l1'] + p['b_l1']
    l2 = pooled @ p['w_l2'] + p['b_l2']
    logits = jnp.concatenate([l1, l2], axis=1) @ p['w_clf'] + p['b_clf']
    return logits, l1, l2


# --------------------------------- main ----------------------------------------
if __name__ == "__main__":
    key = jax.random.PRNGKey(0)
    kp, ki, kl1, kl2 = jax.random.split(key, 4)
    logical = init_params(kp)
    packed = pack_params(logical)

    input_ids = jax.random.randint(ki, (B, S), 0, VOCAB)
    label_l1 = jax.random.randint(kl1, (B,), 0, N_CLASS_L1)
    label_l2 = jax.random.randint(kl2, (B,), 0, N_CLASS_L2)

    outs = forward(packed, input_ids, label_l1, label_l2)
    outs = jax.block_until_ready(outs)
    logits, l1_logits, l2_logits, y1, y2 = outs

    assert logits.shape == (B, N_CLASS_L2)
    assert l1_logits.shape == (B, N_CLASS_L1)
    assert l2_logits.shape == (B, N_CLASS_L2)
    assert bool(jnp.all(jnp.isfinite(logits)))
    assert bool(jnp.all(jnp.isfinite(l1_logits)))
    assert bool(jnp.all(jnp.isfinite(l2_logits)))

    # correctness check against a pure-JAX reference with matching numerics
    ref_logits, ref_l1, ref_l2 = reference_forward(logical, input_ids)
    assert bool(jnp.allclose(logits, ref_logits, atol=2e-4, rtol=2e-2))
    assert bool(jnp.allclose(l1_logits, ref_l1, atol=2e-4, rtol=2e-2))
    assert bool(jnp.allclose(l2_logits, ref_l2, atol=2e-4, rtol=2e-2))

    # inference path of the original module
    inf_logits, inf_y2 = forward(packed, input_ids, label_l1, label_l2,
                                 inference=True)
    assert inf_logits.shape == (B, N_CLASS_L2)

    print("KERNEL_OK")
</pallas_src>

<mosaic_0001>
module attributes {stable_mosaic.version = 11 : i64} {
  func.func @e2e_bibert_kernel(%arg0: i32, %arg1: memref<1x8x32xf32, #tpu.memory_space<vmem>>, %arg2: memref<2x232x128xbf16, #tpu.memory_space<vmem>>, %arg3: memref<216x128xf32, #tpu.memory_space<vmem>>, %arg4: memref<1x8x128xf32, #tpu.memory_space<vmem>>) attributes {dimension_semantics = [#tpu.dimension_semantics<parallel>], iteration_bounds = array<i64: 2>, scalar_prefetch = 0 : i64, scratch_operands = 0 : i64, tpu.core_type = #tpu.core_type<tc>, window_params = [{transform_indices = @transform_0, window_bounds = array<i64: 1, 8, 32>}, {pipeline_mode = #tpu.pipeline_mode<synchronous>, transform_indices = @transform_1, window_bounds = array<i64: 2, 232, 128>}, {pipeline_mode = #tpu.pipeline_mode<synchronous>, transform_indices = @transform_2, window_bounds = array<i64: 216, 128>}, {transform_indices = @transform_3, window_bounds = array<i64: 1, 8, 128>}]} {
    %0 = tpu.iota {dimensions = array<i32: 0>} : vector<32x32xi32>
    %1 = tpu.iota {dimensions = array<i32: 1>} : vector<32x32xi32>
    %c3_i32 = arith.constant 3 : i32
    %2 = vector.broadcast %c3_i32 : i32 to vector<32x32xi32>
    %3 = arith.shrsi %0, %2 : vector<32x32xi32>
    %c3_i32_0 = arith.constant 3 : i32
    %4 = vector.broadcast %c3_i32_0 : i32 to vector<32x32xi32>
    %5 = arith.shrsi %1, %4 : vector<32x32xi32>
    %6 = arith.cmpi eq, %3, %5 : vector<32x32xi32>
    %7 = arith.extui %6 : vector<32x32xi1> to vector<32x32xi32>
    %8 = arith.sitofp %7 : vector<32x32xi32> to vector<32x32xf32>
    %9 = tpu.iota {dimensions = array<i32: 0>} : vector<8x32xi32>
    %10 = tpu.iota {dimensions = array<i32: 1>} : vector<8x32xi32>
    %c7_i32 = arith.constant 7 : i32
    %11 = vector.broadcast %c7_i32 : i32 to vector<8x32xi32>
    %12 = arith.andi %10, %11 : vector<8x32xi32>
    %13 = arith.cmpi eq, %12, %9 : vector<8x32xi32>
    %14 = arith.extui %13 : vector<8x32xi1> to vector<8x32xi32>
    %15 = arith.sitofp %14 : vector<8x32xi32> to vector<8x32xf32>
    %c0 = arith.constant 0 : index
    %c0_1 = arith.constant 0 : index
    %c0_2 = arith.constant 0 : index
    %16 = vector.load %arg1[%c0, %c0_1, %c0_2] : memref<1x8x32xf32, #tpu.memory_space<vmem>>, vector<1x8x32xf32>
    %17 = vector.shape_cast %16 : vector<1x8x32xf32> to vector<8x32xf32>
    %c0_3 = arith.constant 0 : index
    %c0_4 = arith.constant 0 : index
    %18 = vector.load %arg3[%c0_3, %c0_4] : memref<216x128xf32, #tpu.memory_space<vmem>>, vector<8x32xf32>
    %19 = arith.addf %17, %18 : vector<8x32xf32>
    %c8 = arith.constant 8 : index
    %c0_5 = arith.constant 0 : index
    %20 = vector.load %arg3[%c8, %c0_5] : memref<216x128xf32, #tpu.memory_space<vmem>>, vector<1x32xf32>
    %c9 = arith.constant 9 : index
    %c0_6 = arith.constant 0 : index
    %21 = vector.load %arg3[%c9, %c0_6] : memref<216x128xf32, #tpu.memory_space<vmem>>, vector<1x32xf32>
    %cst = arith.constant dense<0.000000e+00> : vector<8xf32>
    %22 = vector.multi_reduction <add>, %19, %cst [1] : vector<8x32xf32> to vector<8xf32>
    %23 = vector.shape_cast %22 : vector<8xf32> to vector<8x1xf32>
    %cst_7 = arith.constant 3.200000e+01 : f32
    %24 = vector.broadcast %cst_7 : f32 to vector<8x1xf32>
    %25 = arith.divf %23, %24 : vector<8x1xf32>
    %26 = vector.broadcast %25 : vector<8x1xf32> to vector<8x32xf32>
    %27 = arith.subf %19, %26 : vector<8x32xf32>
    %28 = arith.mulf %27, %27 : vector<8x32xf32>
    %cst_8 = arith.constant dense<0.000000e+00> : vector<8xf32>
    %29 = vector.multi_reduction <add>, %28, %cst_8 [1] : vector<8x32xf32> to vector<8xf32>
    %30 = vector.shape_cast %29 : vector<8xf32> to vector<8x1xf32>
    %cst_9 = arith.constant 3.200000e+01 : f32
    %31 = vector.broadcast %cst_9 : f32 to vector<8x1xf32>
    %32 = arith.divf %30, %31 : vector<8x1xf32>
    %33 = vector.broadcast %25 : vector<8x1xf32> to vector<8x32xf32>
    %34 = arith.subf %19, %33 : vector<8x32xf32>
    %cst_10 = arith.constant 9.99999996E-13 : f32
    %35 = vector.broadcast %cst_10 : f32 to vector<8x1xf32>
    %36 = arith.addf %32, %35 : vector<8x1xf32>
    %37 = math.rsqrt %36 : vector<8x1xf32>
    %38 = vector.broadcast %37 : vector<8x1xf32> to vector<8x32xf32>
    %39 = arith.mulf %34, %38 : vector<8x32xf32>
    %40 = vector.broadcast %20 : vector<1x32xf32> to vector<8x32xf32>
    %41 = arith.mulf %39, %40 : vector<8x32xf32>
    %42 = vector.broadcast %21 : vector<1x32xf32> to vector<8x32xf32>
    %43 = arith.addf %41, %42 : vector<8x32xf32>
    %44 = arith.truncf %43 : vector<8x32xf32> to vector<8x32xbf16>
    %c0_11 = arith.constant 0 : index
    %c0_12 = arith.constant 0 : index
    %c0_13 = arith.constant 0 : index
    %45 = vector.load %arg2[%c0_11, %c0_12, %c0_13] : memref<2x232x128xbf16, #tpu.memory_space<vmem>>, vector<1x32x96xbf16>
    %46 = vector.shape_cast %45 : vector<1x32x96xbf16> to vector<32x96xbf16>
    %c0_14 = arith.constant 0 : index
    %c32 = arith.constant 32 : index
    %c0_15 = arith.constant 0 : index
    %47 = vector.load %arg2[%c0_14, %c32, %c0_15] : memref<2x232x128xbf16, #tpu.memory_space<vmem>>, vector<1x1x96xbf16>
    %48 = vector.shape_cast %47 : vector<1x1x96xbf16> to vector<1x96xbf16>
    %49 = arith.extf %48 : vector<1x96xbf16> to vector<1x96xf32>
    %cst_16 = arith.constant dense<0.000000e+00> : vector<8x96xf32>
    %50 = tpu.matmul %44, %46, %cst_16 {dimension_numbers = #tpu.dot_dimension_numbers<[1], [0], [0], [1], [0, 0, 1, 1], [], []>} : vector<8x32xbf16>, vector<32x96xbf16>, vector<8x96xf32> -> vector<8x96xf32>
    %51 = vector.broadcast %49 : vector<1x96xf32> to vector<8x96xf32>
    %52 = arith.addf %50, %51 : vector<8x96xf32>
    %53 = vector.extract_strided_slice %52 {offsets = [0, 0], sizes = [8, 32], strides = [1, 1]} : vector<8x96xf32> to vector<8x32xf32>
    %54 = vector.extract_strided_slice %52 {offsets = [0, 32], sizes = [8, 32], strides = [1, 1]} : vector<8x96xf32> to vector<8x32xf32>
    %55 = vector.extract_strided_slice %52 {offsets = [0, 64], sizes = [8, 32], strides = [1, 1]} : vector<8x96xf32> to vector<8x32xf32>
    %56 = tpu.concatenate %53, %53, %53, %53 in 0 : vector<8x32xf32>, vector<8x32xf32>, vector<8x32xf32>, vector<8x32xf32> -> vector<32x32xf32>
    %57 = arith.mulf %56, %8 : vector<32x32xf32>
    %58 = arith.truncf %57 : vector<32x32xf32> to vector<32x32xbf16>
    %59 = arith.truncf %54 : vector<8x32xf32> to vector<8x32xbf16>
    %cst_17 = arith.constant dense<0.000000e+00> : vector<32x8xf32>
    %60 = tpu.matmul %58, %59, %cst_17 {dimension_numbers = #tpu.dot_dimension_numbers<[1], [1], [0], [0], [0, 0, 1, 0], [], []>} : vector<32x32xbf16>, vector<8x32xbf16>, vector<32x8xf32> -> vector<32x8xf32>
    %cst_18 = arith.constant dense<0xFF800000> : vector<32xf32>
    %61 = vector.multi_reduction <maximumf>, %60, %cst_18 [1] : vector<32x8xf32> to vector<32xf32>
    %62 = vector.shape_cast %61 : vector<32xf32> to vector<32x1xf32>
    %63 = vector.broadcast %62 : vector<32x1xf32> to vector<32x8xf32>
    %64 = arith.subf %60, %63 : vector<32x8xf32>
    %65 = math.exp %64 : vector<32x8xf32>
    %cst_19 = arith.constant dense<0.000000e+00> : vector<32xf32>
    %66 = vector.multi_reduction <add>, %65, %cst_19 [1] : vector<32x8xf32> to vector<32xf32>
    %67 = vector.shape_cast %66 : vector<32xf32> to vector<32x1xf32>
    %68 = tpu.reciprocal %67 {approx = true} : vector<32x1xf32> -> vector<32x1xf32>
    %69 = vector.broadcast %68 : vector<32x1xf32> to vector<32x8xf32>
    %70 = arith.mulf %65, %69 : vector<32x8xf32>
    %71 = arith.truncf %70 : vector<32x8xf32> to vector<32x8xbf16>
    %72 = arith.truncf %55 : vector<8x32xf32> to vector<8x32xbf16>
    %cst_20 = arith.constant dense<0.000000e+00> : vector<32x32xf32>
    %73 = tpu.matmul %71, %72, %cst_20 {dimension_numbers = #tpu.dot_dimension_numbers<[1], [0], [0], [1], [0, 0, 1, 1], [], []>} : vector<32x8xbf16>, vector<8x32xbf16>, vector<32x32xf32> -> vector<32x32xf32>
    %74 = arith.mulf %73, %8 : vector<32x32xf32>
    %cst_21 = arith.constant dense<0.000000e+00> : vector<8x32xf32>
    %75 = tpu.matmul %15, %74, %cst_21 {dimension_numbers = #tpu.dot_dimension_numbers<[1], [0], [0], [1], [0, 0, 1, 1], [], []>} : vector<8x32xf32>, vector<32x32xf32>, vector<8x32xf32> -> vector<8x32xf32>
    %c0_22 = arith.constant 0 : index
    %c33 = arith.constant 33 : index
    %c0_23 = arith.constant 0 : index
    %76 = vector.load %arg2[%c0_22, %c33, %c0_23] : memref<2x232x128xbf16, #tpu.memory_space<vmem>>, vector<1x32x32xbf16>
    %77 = vector.shape_cast %76 : vector<1x32x32xbf16> to vector<32x32xbf16>
    %c0_24 = arith.constant 0 : index
    %c65 = arith.constant 65 : index
    %c0_25 = arith.constant 0 : index
    %78 = vector.load %arg2[%c0_24, %c65, %c0_25] : memref<2x232x128xbf16, #tpu.memory_space<vmem>>, vector<1x1x32xbf16>
    %79 = vector.shape_cast %78 : vector<1x1x32xbf16> to vector<1x32xbf16>
    %80 = arith.extf %79 : vector<1x32xbf16> to vector<1x32xf32>
    %81 = arith.truncf %75 : vector<8x32xf32> to vector<8x32xbf16>
    %cst_26 = arith.constant dense<0.000000e+00> : vector<8x32xf32>
    %82 = tpu.matmul %81, %77, %cst_26 {dimension_numbers = #tpu.dot_dimension_numbers<[1], [0], [0], [1], [0, 0, 1, 1], [], []>} : vector<8x32xbf16>, vector<32x32xbf16>, vector<8x32xf32> -> vector<8x32xf32>
    %83 = vector.broadcast %80 : vector<1x32xf32> to vector<8x32xf32>
    %84 = arith.addf %82, %83 : vector<8x32xf32>
    %c10 = arith.constant 10 : index
    %c0_27 = arith.constant 0 : index
    %85 = vector.load %arg3[%c10, %c0_27] : memref<216x128xf32, #tpu.memory_space<vmem>>, vector<1x32xf32>
    %c11 = arith.constant 11 : index
    %c0_28 = arith.constant 0 : index
    %86 = vector.load %arg3[%c11, %c0_28] : memref<216x128xf32, #tpu.memory_space<vmem>>, vector<1x32xf32>
    %c12 = arith.constant 12 : index
    %c0_29 = arith.constant 0 : index
    %87 = vector.load %arg3[%c12, %c0_29] : memref<216x128xf32, #tpu.memory_space<vmem>>, vector<1x32xf32>
    %c13 = arith.constant 13 : index
    %c0_30 = arith.constant 0 : index
    %88 = vector.load %arg3[%c13, %c0_30] : memref<216x128xf32, #tpu.memory_space<vmem>>, vector<1x32xf32>
    %89 = arith.addf %43, %84 : vector<8x32xf32>
    %cst_31 = arith.constant dense<0.000000e+00> : vector<8xf32>
    %90 = vector.multi_reduction <add>, %89, %cst_31 [1] : vector<8x32xf32> to vector<8xf32>
    %91 = vector.shape_cast %90 : vector<8xf32> to vector<8x1xf32>
    %cst_32 = arith.constant 3.200000e+01 : f32
    %92 = vector.broadcast %cst_32 : f32 to vector<8x1xf32>
    %93 = arith.divf %91, %92 : vector<8x1xf32>
    %94 = vector.broadcast %93 : vector<8x1xf32> to vector<8x32xf32>
    %95 = arith.subf %89, %94 : vector<8x32xf32>
    %96 = arith.mulf %95, %95 : vector<8x32xf32>
    %cst_33 = arith.constant dense<0.000000e+00> : vector<8xf32>
    %97 = vector.multi_reduction <add>, %96, %cst_33 [1] : vector<8x32xf32> to vector<8xf32>
    %98 = vector.shape_cast %97 : vector<8xf32> to vector<8x1xf32>
    %cst_34 = arith.constant 3.200000e+01 : f32
    %99 = vector.broadcast %cst_34 : f32 to vector<8x1xf32>
    %100 = arith.divf %98, %99 : vector<8x1xf32>
    %101 = vector.broadcast %93 : vector<8x1xf32> to vector<8x32xf32>
    %102 = arith.subf %89, %101 : vector<8x32xf32>
    %cst_35 = arith.constant 9.99999996E-13 : f32
    %103 = vector.broadcast %cst_35 : f32 to vector<8x1xf32>
    %104 = arith.addf %100, %103 : vector<8x1xf32>
    %105 = math.rsqrt %104 : vector<8x1xf32>
    %106 = vector.broadcast %105 : vector<8x1xf32> to vector<8x32xf32>
    %107 = arith.mulf %102, %106 : vector<8x32xf32>
    %108 = vector.broadcast %85 : vector<1x32xf32> to vector<8x32xf32>
    %109 = arith.mulf %107, %108 : vector<8x32xf32>
    %110 = vector.broadcast %86 : vector<1x32xf32> to vector<8x32xf32>
    %111 = arith.addf %109, %110 : vector<8x32xf32>
    %c0_36 = arith.constant 0 : index
    %c66 = arith.constant 66 : index
    %c0_37 = arith.constant 0 : index
    %112 = vector.load %arg2[%c0_36, %c66, %c0_37] : memref<2x232x128xbf16, #tpu.memory_space<vmem>>, vector<1x32x128xbf16>
    %113 = vector.shape_cast %112 : vector<1x32x128xbf16> to vector<32x128xbf16>
    %c0_38 = arith.constant 0 : index
    %c98 = arith.constant 98 : index
    %c0_39 = arith.constant 0 : index
    %114 = vector.load %arg2[%c0_38, %c98, %c0_39] : memref<2x232x128xbf16, #tpu.memory_space<vmem>>, vector<1x1x128xbf16>
    %115 = vector.shape_cast %114 : vector<1x1x128xbf16> to vector<1x128xbf16>
    %116 = arith.extf %115 : vector<1x128xbf16> to vector<1x128xf32>
    %117 = arith.truncf %111 : vector<8x32xf32> to vector<8x32xbf16>
    %cst_40 = arith.constant dense<0.000000e+00> : vector<8x128xf32>
    %118 = tpu.matmul %117, %113, %cst_40 {dimension_numbers = #tpu.dot_dimension_numbers<[1], [0], [0], [1], [0, 0, 1, 1], [], []>} : vector<8x32xbf16>, vector<32x128xbf16>, vector<8x128xf32> -> vector<8x128xf32>
    %119 = vector.broadcast %116 : vector<1x128xf32> to vector<8x128xf32>
    %120 = arith.addf %118, %119 : vector<8x128xf32>
    %121 = arith.mulf %120, %120 : vector<8x128xf32>
    %122 = arith.mulf %120, %121 : vector<8x128xf32>
    %cst_41 = arith.constant 4.471500e-02 : f32
    %123 = vector.broadcast %cst_41 : f32 to vector<8x128xf32>
    %124 = arith.mulf %123, %122 : vector<8x128xf32>
    %125 = arith.addf %120, %124 : vector<8x128xf32>
    %cst_42 = arith.constant 0.797884583 : f32
    %126 = vector.broadcast %cst_42 : f32 to vector<8x128xf32>
    %127 = arith.mulf %126, %125 : vector<8x128xf32>
    %128 = math.tanh %127 : vector<8x128xf32>
    %cst_43 = arith.constant 1.000000e+00 : f32
    %129 = vector.broadcast %cst_43 : f32 to vector<8x128xf32>
    %130 = arith.addf %129, %128 : vector<8x128xf32>
    %cst_44 = arith.constant 5.000000e-01 : f32
    %131 = vector.broadcast %cst_44 : f32 to vector<8x128xf32>
    %132 = arith.mulf %131, %130 : vector<8x128xf32>
    %133 = arith.mulf %120, %132 : vector<8x128xf32>
    %c0_45 = arith.constant 0 : index
    %c99 = arith.constant 99 : index
    %c0_46 = arith.constant 0 : index
    %134 = vector.load %arg2[%c0_45, %c99, %c0_46] : memref<2x232x128xbf16, #tpu.memory_space<vmem>>, vector<1x128x32xbf16>
    %135 = vector.shape_cast %134 : vector<1x128x32xbf16> to vector<128x32xbf16>
    %c0_47 = arith.constant 0 : index
    %c227 = arith.constant 227 : index
    %c0_48 = arith.constant 0 : index
    %136 = vector.load %arg2[%c0_47, %c227, %c0_48] : memref<2x232x128xbf16, #tpu.memory_space<vmem>>, vector<1x1x32xbf16>
    %137 = vector.shape_cast %136 : vector<1x1x32xbf16> to vector<1x32xbf16>
    %138 = arith.extf %137 : vector<1x32xbf16> to vector<1x32xf32>
    %139 = arith.truncf %133 : vector<8x128xf32> to vector<8x128xbf16>
    %cst_49 = arith.constant dense<0.000000e+00> : vector<8x32xf32>
    %140 = tpu.matmul %139, %135, %cst_49 {dimension_numbers = #tpu.dot_dimension_numbers<[1], [0], [0], [1], [0, 0, 1, 1], [], []>} : vector<8x128xbf16>, vector<128x32xbf16>, vector<8x32xf32> -> vector<8x32xf32>
    %141 = vector.broadcast %138 : vector<1x32xf32> to vector<8x32xf32>
    %142 = arith.addf %140, %141 : vector<8x32xf32>
    %143 = arith.addf %111, %142 : vector<8x32xf32>
    %cst_50 = arith.constant dense<0.000000e+00> : vector<8xf32>
    %144 = vector.multi_reduction <add>, %143, %cst_50 [1] : vector<8x32xf32> to vector<8xf32>
    %145 = vector.shape_cast %144 : vector<8xf32> to vector<8x1xf32>
    %cst_51 = arith.constant 3.200000e+01 : f32
    %146 = vector.broadcast %cst_51 : f32 to vector<8x1xf32>
    %147 = arith.divf %145, %146 : vector<8x1xf32>
    %148 = vector.broadcast %147 : vector<8x1xf32> to vector<8x32xf32>
    %149 = arith.subf %143, %148 : vector<8x32xf32>
    %150 = arith.mulf %149, %149 : vector<8x32xf32>
    %cst_52 = arith.constant dense<0.000000e+00> : vector<8xf32>
    %151 = vector.multi_reduction <add>, %150, %cst_52 [1] : vector<8x32xf32> to vector<8xf32>
    %152 = vector.shape_cast %151 : vector<8xf32> to vector<8x1xf32>
    %cst_53 = arith.constant 3.200000e+01 : f32
    %153 = vector.broadcast %cst_53 : f32 to vector<8x1xf32>
    %154 = arith.divf %152, %153 : vector<8x1xf32>
    %155 = vector.broadcast %147 : vector<8x1xf32> to vector<8x32xf32>
    %156 = arith.subf %143, %155 : vector<8x32xf32>
    %cst_54 = arith.constant 9.99999996E-13 : f32
    %157 = vector.broadcast %cst_54 : f32 to vector<8x1xf32>
    %158 = arith.addf %154, %157 : vector<8x1xf32>
    %159 = math.rsqrt %158 : vector<8x1xf32>
    %160 = vector.broadcast %159 : vector<8x1xf32> to vector<8x32xf32>
    %161 = arith.mulf %156, %160 : vector<8x32xf32>
    %162 = vector.broadcast %87 : vector<1x32xf32> to vector<8x32xf32>
    %163 = arith.mulf %161, %162 : vector<8x32xf32>
    %164 = vector.broadcast %88 : vector<1x32xf32> to vector<8x32xf32>
    %165 = arith.addf %163, %164 : vector<8x32xf32>
    %166 = arith.truncf %165 : vector<8x32xf32> to vector<8x32xbf16>
    %c1 = arith.constant 1 : index
    %c0_55 = arith.constant 0 : index
    %c0_56 = arith.constant 0 : index
    %167 = vector.load %arg2[%c1, %c0_55, %c0_56] : memref<2x232x128xbf16, #tpu.memory_space<vmem>>, vector<1x32x96xbf16>
    %168 = vector.shape_cast %167 : vector<1x32x96xbf16> to vector<32x96xbf16>
    %c1_57 = arith.constant 1 : index
    %c32_58 = arith.constant 32 : index
    %c0_59 = arith.constant 0 : index
    %169 = vector.load %arg2[%c1_57, %c32_58, %c0_59] : memref<2x232x128xbf16, #tpu.memory_space<vmem>>, vector<1x1x96xbf16>
    %170 = vector.shape_cast %169 : vector<1x1x96xbf16> to vector<1x96xbf16>
    %171 = arith.extf %170 : vector<1x96xbf16> to vector<1x96xf32>
    %cst_60 = arith.constant dense<0.000000e+00> : vector<8x96xf32>
    %172 = tpu.matmul %166, %168, %cst_60 {dimension_numbers = #tpu.dot_dimension_numbers<[1], [0], [0], [1], [0, 0, 1, 1], [], []>} : vector<8x32xbf16>, vector<32x96xbf16>, vector<8x96xf32> -> vector<8x96xf32>
    %173 = vector.broadcast %171 : vector<1x96xf32> to vector<8x96xf32>
    %174 = arith.addf %172, %173 : vector<8x96xf32>
    %175 = vector.extract_strided_slice %174 {offsets = [0, 0], sizes = [8, 32], strides = [1, 1]} : vector<8x96xf32> to vector<8x32xf32>
    %176 = vector.extract_strided_slice %174 {offsets = [0, 32], sizes = [8, 32], strides = [1, 1]} : vector<8x96xf32> to vector<8x32xf32>
    %177 = vector.extract_strided_slice %174 {offsets = [0, 64], sizes = [8, 32], strides = [1, 1]} : vector<8x96xf32> to vector<8x32xf32>
    %178 = tpu.concatenate %175, %175, %175, %175 in 0 : vector<8x32xf32>, vector<8x32xf32>, vector<8x32xf32>, vector<8x32xf32> -> vector<32x32xf32>
    %179 = arith.mulf %178, %8 : vector<32x32xf32>
    %180 = arith.truncf %179 : vector<32x32xf32> to vector<32x32xbf16>
    %181 = arith.truncf %176 : vector<8x32xf32> to vector<8x32xbf16>
    %cst_61 = arith.constant dense<0.000000e+00> : vector<32x8xf32>
    %182 = tpu.matmul %180, %181, %cst_61 {dimension_numbers = #tpu.dot_dimension_numbers<[1], [1], [0], [0], [0, 0, 1, 0], [], []>} : vector<32x32xbf16>, vector<8x32xbf16>, vector<32x8xf32> -> vector<32x8xf32>
    %cst_62 = arith.constant dense<0xFF800000> : vector<32xf32>
    %183 = vector.multi_reduction <maximumf>, %182, %cst_62 [1] : vector<32x8xf32> to vector<32xf32>
    %184 = vector.shape_cast %183 : vector<32xf32> to vector<32x1xf32>
    %185 = vector.broadcast %184 : vector<32x1xf32> to vector<32x8xf32>
    %186 = arith.subf %182, %185 : vector<32x8xf32>
    %187 = math.exp %186 : vector<32x8xf32>
    %cst_63 = arith.constant dense<0.000000e+00> : vector<32xf32>
    %188 = vector.multi_reduction <add>, %187, %cst_63 [1] : vector<32x8xf32> to vector<32xf32>
    %189 = vector.shape_cast %188 : vector<32xf32> to vector<32x1xf32>
    %190 = tpu.reciprocal %189 {approx = true} : vector<32x1xf32> -> vector<32x1xf32>
    %191 = vector.broadcast %190 : vector<32x1xf32> to vector<32x8xf32>
    %192 = arith.mulf %187, %191 : vector<32x8xf32>
    %193 = arith.truncf %192 : vector<32x8xf32> to vector<32x8xbf16>
    %194 = arith.truncf %177 : vector<8x32xf32> to vector<8x32xbf16>
    %cst_64 = arith.constant dense<0.000000e+00> : vector<32x32xf32>
    %195 = tpu.matmul %193, %194, %cst_64 {dimension_numbers = #tpu.dot_dimension_numbers<[1], [0], [0], [1], [0, 0, 1, 1], [], []>} : vector<32x8xbf16>, vector<8x32xbf16>, vector<32x32xf32> -> vector<32x32xf32>
    %196 = arith.mulf %195, %8 : vector<32x32xf32>
    %cst_65 = arith.constant dense<0.000000e+00> : vector<8x32xf32>
    %197 = tpu.matmul %15, %196, %cst_65 {dimension_numbers = #tpu.dot_dimension_numbers<[1], [0], [0], [1], [0, 0, 1, 1], [], []>} : vector<8x32xf32>, vector<32x32xf32>, vector<8x32xf32> -> vector<8x32xf32>
    %c1_66 = arith.constant 1 : index
    %c33_67 = arith.constant 33 : index
    %c0_68 = arith.constant 0 : index
    %198 = vector.load %arg2[%c1_66, %c33_67, %c0_68] : memref<2x232x128xbf16, #tpu.memory_space<vmem>>, vector<1x32x32xbf16>
    %199 = vector.shape_cast %198 : vector<1x32x32xbf16> to vector<32x32xbf16>
    %c1_69 = arith.constant 1 : index
    %c65_70 = arith.constant 65 : index
    %c0_71 = arith.constant 0 : index
    %200 = vector.load %arg2[%c1_69, %c65_70, %c0_71] : memref<2x232x128xbf16, #tpu.memory_space<vmem>>, vector<1x1x32xbf16>
    %201 = vector.shape_cast %200 : vector<1x1x32xbf16> to vector<1x32xbf16>
    %202 = arith.extf %201 : vector<1x32xbf16> to vector<1x32xf32>
    %203 = arith.truncf %197 : vector<8x32xf32> to vector<8x32xbf16>
    %cst_72 = arith.constant dense<0.000000e+00> : vector<8x32xf32>
    %204 = tpu.matmul %203, %199, %cst_72 {dimension_numbers = #tpu.dot_dimension_numbers<[1], [0], [0], [1], [0, 0, 1, 1], [], []>} : vector<8x32xbf16>, vector<32x32xbf16>, vector<8x32xf32> -> vector<8x32xf32>
    %205 = vector.broadcast %202 : vector<1x32xf32> to vector<8x32xf32>
    %206 = arith.addf %204, %205 : vector<8x32xf32>
    %c14 = arith.constant 14 : index
    %c0_73 = arith.constant 0 : index
    %207 = vector.load %arg3[%c14, %c0_73] : memref<216x128xf32, #tpu.memory_space<vmem>>, vector<1x32xf32>
    %c15 = arith.constant 15 : index
    %c0_74 = arith.constant 0 : index
    %208 = vector.load %arg3[%c15, %c0_74] : memref<216x128xf32, #tpu.memory_space<vmem>>, vector<1x32xf32>
    %c16 = arith.constant 16 : index
    %c0_75 = arith.constant 0 : index
    %209 = vector.load %arg3[%c16, %c0_75] : memref<216x128xf32, #tpu.memory_space<vmem>>, vector<1x32xf32>
    %c17 = arith.constant 17 : index
    %c0_76 = arith.constant 0 : index
    %210 = vector.load %arg3[%c17, %c0_76] : memref<216x128xf32, #tpu.memory_space<vmem>>, vector<1x32xf32>
    %211 = arith.addf %165, %206 : vector<8x32xf32>
    %cst_77 = arith.constant dense<0.000000e+00> : vector<8xf32>
    %212 = vector.multi_reduction <add>, %211, %cst_77 [1] : vector<8x32xf32> to vector<8xf32>
    %213 = vector.shape_cast %212 : vector<8xf32> to vector<8x1xf32>
    %cst_78 = arith.constant 3.200000e+01 : f32
    %214 = vector.broadcast %cst_78 : f32 to vector<8x1xf32>
    %215 = arith.divf %213, %214 : vector<8x1xf32>
    %216 = vector.broadcast %215 : vector<8x1xf32> to vector<8x32xf32>
    %217 = arith.subf %211, %216 : vector<8x32xf32>
    %218 = arith.mulf %217, %217 : vector<8x32xf32>
    %cst_79 = arith.constant dense<0.000000e+00> : vector<8xf32>
    %219 = vector.multi_reduction <add>, %218, %cst_79 [1] : vector<8x32xf32> to vector<8xf32>
    %220 = vector.shape_cast %219 : vector<8xf32> to vector<8x1xf32>
    %cst_80 = arith.constant 3.200000e+01 : f32
    %221 = vector.broadcast %cst_80 : f32 to vector<8x1xf32>
    %222 = arith.divf %220, %221 : vector<8x1xf32>
    %223 = vector.broadcast %215 : vector<8x1xf32> to vector<8x32xf32>
    %224 = arith.subf %211, %223 : vector<8x32xf32>
    %cst_81 = arith.constant 9.99999996E-13 : f32
    %225 = vector.broadcast %cst_81 : f32 to vector<8x1xf32>
    %226 = arith.addf %222, %225 : vector<8x1xf32>
    %227 = math.rsqrt %226 : vector<8x1xf32>
    %228 = vector.broadcast %227 : vector<8x1xf32> to vector<8x32xf32>
    %229 = arith.mulf %224, %228 : vector<8x32xf32>
    %230 = vector.broadcast %207 : vector<1x32xf32> to vector<8x32xf32>
    %231 = arith.mulf %229, %230 : vector<8x32xf32>
    %232 = vector.broadcast %208 : vector<1x32xf32> to vector<8x32xf32>
    %233 = arith.addf %231, %232 : vector<8x32xf32>
    %c1_82 = arith.constant 1 : index
    %c66_83 = arith.constant 66 : index
    %c0_84 = arith.constant 0 : index
    %234 = vector.load %arg2[%c1_82, %c66_83, %c0_84] : memref<2x232x128xbf16, #tpu.memory_space<vmem>>, vector<1x32x128xbf16>
    %235 = vector.shape_cast %234 : vector<1x32x128xbf16> to vector<32x128xbf16>
    %c1_85 = arith.constant 1 : index
    %c98_86 = arith.constant 98 : index
    %c0_87 = arith.constant 0 : index
    %236 = vector.load %arg2[%c1_85, %c98_86, %c0_87] : memref<2x232x128xbf16, #tpu.memory_space<vmem>>, vector<1x1x128xbf16>
    %237 = vector.shape_cast %236 : vector<1x1x128xbf16> to vector<1x128xbf16>
    %238 = arith.extf %237 : vector<1x128xbf16> to vector<1x128xf32>
    %239 = arith.truncf %233 : vector<8x32xf32> to vector<8x32xbf16>
    %cst_88 = arith.constant dense<0.000000e+00> : vector<8x128xf32>
    %240 = tpu.matmul %239, %235, %cst_88 {dimension_numbers = #tpu.dot_dimension_numbers<[1], [0], [0], [1], [0, 0, 1, 1], [], []>} : vector<8x32xbf16>, vector<32x128xbf16>, vector<8x128xf32> -> vector<8x128xf32>
    %241 = vector.broadcast %238 : vector<1x128xf32> to vector<8x128xf32>
    %242 = arith.addf %240, %241 : vector<8x128xf32>
    %243 = arith.mulf %242, %242 : vector<8x128xf32>
    %244 = arith.mulf %242, %243 : vector<8x128xf32>
    %cst_89 = arith.constant 4.471500e-02 : f32
    %245 = vector.broadcast %cst_89 : f32 to vector<8x128xf32>
    %246 = arith.mulf %245, %244 : vector<8x128xf32>
    %247 = arith.addf %242, %246 : vector<8x128xf32>
    %cst_90 = arith.constant 0.797884583 : f32
    %248 = vector.broadcast %cst_90 : f32 to vector<8x128xf32>
    %249 = arith.mulf %248, %247 : vector<8x128xf32>
    %250 = math.tanh %249 : vector<8x128xf32>
    %cst_91 = arith.constant 1.000000e+00 : f32
    %251 = vector.broadcast %cst_91 : f32 to vector<8x128xf32>
    %252 = arith.addf %251, %250 : vector<8x128xf32>
    %cst_92 = arith.constant 5.000000e-01 : f32
    %253 = vector.broadcast %cst_92 : f32 to vector<8x128xf32>
    %254 = arith.mulf %253, %252 : vector<8x128xf32>
    %255 = arith.mulf %242, %254 : vector<8x128xf32>
    %c1_93 = arith.constant 1 : index
    %c99_94 = arith.constant 99 : index
    %c0_95 = arith.constant 0 : index
    %256 = vector.load %arg2[%c1_93, %c99_94, %c0_95] : memref<2x232x128xbf16, #tpu.memory_space<vmem>>, vector<1x128x32xbf16>
    %257 = vector.shape_cast %256 : vector<1x128x32xbf16> to vector<128x32xbf16>
    %c1_96 = arith.constant 1 : index
    %c227_97 = arith.constant 227 : index
    %c0_98 = arith.constant 0 : index
    %258 = vector.load %arg2[%c1_96, %c227_97, %c0_98] : memref<2x232x128xbf16, #tpu.memory_space<vmem>>, vector<1x1x32xbf16>
    %259 = vector.shape_cast %258 : vector<1x1x32xbf16> to vector<1x32xbf16>
    %260 = arith.extf %259 : vector<1x32xbf16> to vector<1x32xf32>
    %261 = arith.truncf %255 : vector<8x128xf32> to vector<8x128xbf16>
    %cst_99 = arith.constant dense<0.000000e+00> : vector<8x32xf32>
    %262 = tpu.matmul %261, %257, %cst_99 {dimension_numbers = #tpu.dot_dimension_numbers<[1], [0], [0], [1], [0, 0, 1, 1], [], []>} : vector<8x128xbf16>, vector<128x32xbf16>, vector<8x32xf32> -> vector<8x32xf32>
    %263 = vector.broadcast %260 : vector<1x32xf32> to vector<8x32xf32>
    %264 = arith.addf %262, %263 : vector<8x32xf32>
    %265 = arith.addf %233, %264 : vector<8x32xf32>
    %cst_100 = arith.constant dense<0.000000e+00> : vector<8xf32>
    %266 = vector.multi_reduction <add>, %265, %cst_100 [1] : vector<8x32xf32> to vector<8xf32>
    %267 = vector.shape_cast %266 : vector<8xf32> to vector<8x1xf32>
    %cst_101 = arith.constant 3.200000e+01 : f32
    %268 = vector.broadcast %cst_101 : f32 to vector<8x1xf32>
    %269 = arith.divf %267, %268 : vector<8x1xf32>
    %270 = vector.broadcast %269 : vector<8x1xf32> to vector<8x32xf32>
    %271 = arith.subf %265, %270 : vector<8x32xf32>
    %272 = arith.mulf %271, %271 : vector<8x32xf32>
    %cst_102 = arith.constant dense<0.000000e+00> : vector<8xf32>
    %273 = vector.multi_reduction <add>, %272, %cst_102 [1] : vector<8x32xf32> to vector<8xf32>
    %274 = vector.shape_cast %273 : vector<8xf32> to vector<8x1xf32>
    %cst_103 = arith.constant 3.200000e+01 : f32
    %275 = vector.broadcast %cst_103 : f32 to vector<8x1xf32>
    %276 = arith.divf %274, %275 : vector<8x1xf32>
    %277 = vector.broadcast %269 : vector<8x1xf32> to vector<8x32xf32>
    %278 = arith.subf %265, %277 : vector<8x32xf32>
    %cst_104 = arith.constant 9.99999996E-13 : f32
    %279 = vector.broadcast %cst_104 : f32 to vector<8x1xf32>
    %280 = arith.addf %276, %279 : vector<8x1xf32>
    %281 = math.rsqrt %280 : vector<8x1xf32>
    %282 = vector.broadcast %281 : vector<8x1xf32> to vector<8x32xf32>
    %283 = arith.mulf %278, %282 : vector<8x32xf32>
    %284 = vector.broadcast %209 : vector<1x32xf32> to vector<8x32xf32>
    %285 = arith.mulf %283, %284 : vector<8x32xf32>
    %286 = vector.broadcast %210 : vector<1x32xf32> to vector<8x32xf32>
    %287 = arith.addf %285, %286 : vector<8x32xf32>
    %c18 = arith.constant 18 : index
    %c0_105 = arith.constant 0 : index
    %288 = vector.load %arg3[%c18, %c0_105] : memref<216x128xf32, #tpu.memory_space<vmem>>, vector<32x32xf32>
    %c50 = arith.constant 50 : index
    %c0_106 = arith.constant 0 : index
    %289 = vector.load %arg3[%c50, %c0_106] : memref<216x128xf32, #tpu.memory_space<vmem>>, vector<1x32xf32>
    %cst_107 = arith.constant dense<0.000000e+00> : vector<8x32xf32>
    %290 = tpu.matmul %287, %288, %cst_107 {dimension_numbers = #tpu.dot_dimension_numbers<[1], [0], [0], [1], [0, 0, 1, 1], [], []>} : vector<8x32xf32>, vector<32x32xf32>, vector<8x32xf32> -> vector<8x32xf32>
    %291 = vector.broadcast %289 : vector<1x32xf32> to vector<8x32xf32>
    %292 = arith.addf %290, %291 : vector<8x32xf32>
    %293 = math.tanh %292 : vector<8x32xf32>
    %c51 = arith.constant 51 : index
    %c0_108 = arith.constant 0 : index
    %294 = vector.load %arg3[%c51, %c0_108] : memref<216x128xf32, #tpu.memory_space<vmem>>, vector<32x128xf32>
    %c83 = arith.constant 83 : index
    %c0_109 = arith.constant 0 : index
    %295 = vector.load %arg3[%c83, %c0_109] : memref<216x128xf32, #tpu.memory_space<vmem>>, vector<1x128xf32>
    %cst_110 = arith.constant dense<0.000000e+00> : vector<8x128xf32>
    %296 = tpu.matmul %293, %294, %cst_110 {dimension_numbers = #tpu.dot_dimension_numbers<[1], [0], [0], [1], [0, 0, 1, 1], [], []>} : vector<8x32xf32>, vector<32x128xf32>, vector<8x128xf32> -> vector<8x128xf32>
    %297 = vector.broadcast %295 : vector<1x128xf32> to vector<8x128xf32>
    %298 = arith.addf %296, %297 : vector<8x128xf32>
    %c84 = arith.constant 84 : index
    %c0_111 = arith.constant 0 : index
    %299 = vector.load %arg3[%c84, %c0_111] : memref<216x128xf32, #tpu.memory_space<vmem>>, vector<128x128xf32>
    %c212 = arith.constant 212 : index
    %c0_112 = arith.constant 0 : index
    %300 = vector.load %arg3[%c212, %c0_112] : memref<216x128xf32, #tpu.memory_space<vmem>>, vector<1x128xf32>
    %cst_113 = arith.constant dense<0.000000e+00> : vector<8x128xf32>
    %301 = tpu.matmul %298, %299, %cst_113 {dimension_numbers = #tpu.dot_dimension_numbers<[1], [0], [0], [1], [0, 0, 1, 1], [], []>} : vector<8x128xf32>, vector<128x128xf32>, vector<8x128xf32> -> vector<8x128xf32>
    %302 = vector.broadcast %300 : vector<1x128xf32> to vector<8x128xf32>
    %303 = arith.addf %301, %302 : vector<8x128xf32>
    %304 = arith.addf %303, %298 : vector<8x128xf32>
    %c0_114 = arith.constant 0 : index
    %c0_115 = arith.constant 0 : index
    %c0_116 = arith.constant 0 : index
    %305 = vector.load %arg4[%c0_114, %c0_115, %c0_116] : memref<1x8x128xf32, #tpu.memory_space<vmem>>, vector<1x8x128xf32>
    %306 = vector.shape_cast %305 : vector<1x8x128xf32> to vector<8x128xf32>
    %307 = vector.shape_cast %304 : vector<8x128xf32> to vector<1x8x128xf32>
    tpu.vector_store %arg4[%c0_114, %c0_115, %c0_116], %307 {strides = array<i32>} : memref<1x8x128xf32, #tpu.memory_space<vmem>>, vector<1x8x128xf32>,
    return
  }
  func.func @transform_0(%arg0: i32) -> (i32, i32, i32) {
    %c0_i32 = arith.constant 0 : i32
    %c0_i32_0 = arith.constant 0 : i32
    %c0_i32_1 = arith.constant 0 : i32
    return %arg0, %c0_i32, %c0_i32_0 : i32, i32, i32
  }
  func.func @transform_1(%arg0: i32) -> (i32, i32, i32) {
    %c0_i32 = arith.constant 0 : i32
    %c0_i32_0 = arith.constant 0 : i32
    %c0_i32_1 = arith.constant 0 : i32
    %c0_i32_2 = arith.constant 0 : i32
    return %c0_i32, %c0_i32_0, %c0_i32_1 : i32, i32, i32
  }
  func.func @transform_2(%arg0: i32) -> (i32, i32) {
    %c0_i32 = arith.constant 0 : i32
    %c0_i32_0 = arith.constant 0 : i32
    %c0_i32_1 = arith.constant 0 : i32
    return %c0_i32, %c0_i32_0 : i32, i32
  }
  func.func @transform_3(%arg0: i32) -> (i32, i32, i32) {
    %c0_i32 = arith.constant 0 : i32
    %c0_i32_0 = arith.constant 0 : i32
    %c0_i32_1 = arith.constant 0 : i32
    return %arg0, %c0_i32, %c0_i32_0 : i32, i32, i32
  }
}

</mosaic_0001>

<bundles_post_ra>
// kernel: _fused_forward.1
= control target key start
LH: loop header
LB: loop body
LE: loop exit
PB: predicated region body
PF: predicated region fallthrough
CT: control target
= control target key end

     0   :  { %8 = vsyncpa [#allocation3], 0  ;;  %s1809_s12 = smov 0   ;;  %s2124_s0 = inlined_call_operand.vmem [shape: f32[2,8,32], index: 0, kind: input, shape index: {}]   ;;  %s2125_s1 = inlined_call_operand.vmem [shape: bf16[2,232,128], index: 1, kind: input, shape index: {}]   ;;  %s2126_s2 = inlined_call_operand.hbm [shape: f32[216,128], index: 2, kind: input, shape index: {}]   ;;  %s2127_s3 = inlined_call_operand.vmem [shape: f32[2,8,128], index: 3, kind: output, shape index: {}]  }
   0x1 LB: > { %s127_s15 = sshll.u32 %s2126_s2, 4  ;;  %s1444_s16 = sadd.s32 4294967295, %s1780_s12   ;;  %s1780_s12 = sphi %s1809_s12, %s14_s12   ;;  %s128_s15 = int_to_ptr.hbm [resolvable:$true] %s127_s15 }
   0x2   : > { %p1446_p0 = scmp.ge.s32.totalorder %s1780_s12, 1  ;;  %p113_p1 = scmp.lt.s32.totalorder %s1780_s12, 3 }
   0x3   : > { %p1660_p2 = scmp.eq.s32.totalorder %s1444_s16, 0  ;;  %s1782_s17 = smov [#allocation2]  }
   0x4   : > { %p114_p3 = pnand %p1446_p0, %p113_p1  ;;  %s129_s18 = sshll.u32 %s1782_s17, 4  ;;  %s130_s18 = int_to_ptr.vmem [resolvable:$true] %s129_s18 }
   0x5   : > { %s1783_s19 = smov 128   ;;  %s1784_s20 = smov 8  }
   0x6   : > { %p1656_p4 = pneg %p114_p3  ;;  %152 = sbr.rel (%p114_p3) target bundleno = 4512 (0x11a0), region = 32 }
   0x8   : > { %p1657_p5 = pnand %p1660_p2, %p1656_p4 }
   0xa   : > { %1659 = dma.hbm_to_vmem [thread:$0]  (!%p1657_p5), %s128_s15, 3456, %s130_s18, [#allocation3], %s1783_s19, %s1783_s19, %s1784_s20  }
   0xb   : > { %1775 = dma.done.wait (%p1660_p2), [#allocation3], 3456  }
   0xc   : > { %1777 = vsyncadd (%p1660_p2), [#allocation3], 4294963840  ;;  %p175_p6 = scmp.lt.s32.totalorder %s1444_s16, 1  ;;  %v213_v1 = vld [vmem:[#allocation2] sm:$0xff]  ;;  %vm217_vm0 = vcmask 261120   ;;  %v1785_v4 = vmov 32.0   ;;  %v184_v41 = vlaneseq }
   0xd   : > { %1690 = vrcp.f32 %v1785_v4  ;;  %v1625_v16 = vld [vmem:[%s2125_s1 + $0x8] sm:$0xff]  ;;  %v1624_v17 = vld [vmem:[%s2125_s1] sm:$0xff]  ;;  %v256_v34 = vld [vmem:[%s2125_s1 + $0x10] sm:$0x1]  ;;  %s1786_s4 = smov 96   ;;  %v1787_v49 = vmov 0.0  }
   0xe   : > { %s2129_s16 = smov (!%p175_p6, %s1444_s16), 1  ;;  %280 = vmatpush.bf16.msra.mxu0 %v1625_v16  ;;  %v1677_v27 = vld [vmem:[#allocation2 + $0x8] ss:$0 sm:$0xff]  ;;  %v1678_v30 = vld [vmem:[#allocation2 + $0x9] ss:$0 sm:$0xff]  ;;  %v257_v35 = vunpack.c.l.bf16 %v256_v34  ;;  %v1852_v42 = vshrl.u32 %v184_v41, 7 }
   0xf   : > { %s1451_s21 = sshll.u32 %s2129_s16, 3  ;;  %v1855_v44 = vand.u32 127, %v184_v41  ;;  %vm325_vm9 = vcmask 64512   ;;  %s1788_s5 = smov 64   ;;  %vm380_vm10 = vcmask 1043456   ;;  %vm543_vm13 = vcmask 1046528  }
  0x10   : > { %s178_s24 = scalar_lea.vmem %s2124_s0, %s1451_s21  ;;  %v258_v36 = vperm.slane %v257_v35, 0  ;;  %v186_v43 = vadd.s32 8, %v1852_v42  ;;  %v191_v45 = vshra.s32 %v1852_v42, 3  ;;  %v187_v55 = vadd.s32 16, %v1852_v42  ;;  %s182_s23 = scalar_lea.vmem %s2127_s3, %s1451_s21 }
  0x11   : > { %v212_v0 = vld [vmem:[%s178_s24] sm:$0xff]  ;;  %v195_v47 = vshra.s32 %v1855_v44, 3  ;;  %v188_v56 = vadd.s32 24, %v1852_v42  ;;  %vm451_vm12 = vsmask.f32 7424 }
  0x12   : > { %v214_v2 = vadd.f32 %v213_v1, %v212_v0  ;;  %281 = vmatpush.bf16.msra.mxu0 %v1624_v17  ;;  %v192_v46 = vshra.s32 %v186_v43, 3  ;;  %v193_v58 = vshra.s32 %v187_v55, 3  ;;  %vm640_vm14 = vsmask.f32 6400 }
  0x13   : > { %v1691_v5 = vpop.eup %1690  ;;  %vm196_vm5 = vcmp.eq.s32.totalorder %v191_v45, %v195_v47  ;;  %v194_v59 = vshra.s32 %v188_v56, 3  ;;  %v1627_v56 = vld [vmem:[%s2125_s1 + $0x18] sm:$0xff] }
  0x14   : > { %v218_v3 = vsel %vm217_vm0, %v214_v2, 0.0  ;;  %v222_v6 = vmul.f32 32.0, %v1691_v5  ;;  %vm226_vm1 = vweird.f32 %v1691_v5  ;;  %vm197_vm6 = vcmp.eq.s32.totalorder %v192_v46, %v195_v47 }
  0x15   : > { %219 = vadd.xlane.f32.xlu0 %v218_v3  ;;  %v1860_v50 = vsel %vm196_vm5, 1.0, %v1787_v49  ;;  %v1863_v51 = vsel %vm197_vm6, 1.0, %v1787_v49  ;;  %vm198_vm7 = vcmp.eq.s32.totalorder %v193_v58, %v195_v47  ;;  %vm199_vm8 = vcmp.eq.s32.totalorder %v194_v59, %v195_v47 }
  0x16   : > { %v223_v7 = vsub.f32 1.0, %v222_v6  ;;  %v1872_v60 = vsel %vm198_vm7, 1.0, %v1787_v49  ;;  %v1875_v61 = vsel %vm199_vm8, 1.0, %v1787_v49  ;;  %v460_v59 = vshll.u32 %v1627_v56, 16 }
  0x18   : > { %v224_v8 = vmul.f32 %v1691_v5, %v223_v7 }
  0x1a   : > { %v225_v9 = vadd.f32 %v1691_v5, %v224_v8 }
  0x1c   : > { %v1829_v10 = vsel %vm226_vm1, %v1691_v5, %v225_v9 }
  0x88   : > { %v220_v11 = vpop.xlane.xlu0 %219 }
  0x89   : > { %v228_v12 = vmul.f32 %v1829_v10, %v220_v11 }
  0x8b   : > { %v229_v13 = vsub.f32 %v214_v2, %v228_v12 }
  0x8d   : > { %v230_v14 = vmul.f32 %v229_v13, %v229_v13 }
  0x8f   : > { %v231_v15 = vsel %vm217_vm0, %v230_v14, 0.0 }
  0x90   : > { %232 = vadd.xlane.f32.xlu0 %v231_v15 }
 0x103   : > { %v233_v18 = vpop.xlane.xlu0 %232 }
 0x104   : > { %v234_v19 = vmul.f32 %v233_v18, %v1829_v10 }
 0x106   : > { %v235_v20 = vadd.f32 1e-12, %v234_v19 }
 0x108   : > { %1692 = vrsqrt.f32 %v235_v20  ;;  %vm242_vm3 = vweird.f32 %v235_v20 }
 0x10e   : > { %v1693_v21 = vpop.eup %1692 }
 0x10f   : > { %v237_v22 = vmul.f32 %v1693_v21, %v235_v20  ;;  %vm243_vm2 = vweird.f32 %v1693_v21 }
 0x110   : > { %vm244_vm4 = vmor %vm242_vm3, %vm243_vm2 }
 0x111   : > { %v238_v23 = vmul.f32 %v1693_v21, %v237_v22 }
 0x113   : > { %v239_v24 = vmul.f32 0.5, %v238_v23 }
 0x115   : > { %v240_v25 = vsub.f32 1.5, %v239_v24 }
 0x117   : > { %v241_v26 = vmul.f32 %v1693_v21, %v240_v25 }
 0x119   : > { %v245_v28 = vsel %vm244_vm4, %v1693_v21, %v241_v26 }
 0x11a   : > { %v246_v29 = vmul.f32 %v245_v28, %v229_v13 }
 0x11c   : > { %v248_v31 = vmul.f32 %v1677_v27, %v246_v29 }
 0x11e   : > { %v1840_v32 = vadd.f32 %v1678_v30, %v248_v31 }
 0x120   : > { %v251_v33 = vpack.c.bf16 %v1840_v32, %v1840_v32 }
 0x122   : > { %1466 = vmatmul.msk.bf16.vlgmr.msra.gmra.mxu0 %vm217_vm0, %v251_v33 }
 0x19f   : > { %v283_v37 = vpop.f32.mrf.mxu0 }
 0x1a0   : > { %v284_v38 = vadd.f32 %v283_v37, %v258_v36 }
 0x1a2   : > { %v1848_v39 = vpack.c.bf16 %v284_v38, %v284_v38  ;;  %v287_v53 = vmul.f32 %v1860_v50, %v284_v38  ;;  %v288_v54 = vmul.f32 %v1863_v51, %v284_v38  ;;  %v289_v62 = vmul.f32 %v1872_v60, %v284_v38 }
 0x1a3   : > { %v290_v63 = vmul.f32 %v1875_v61, %v284_v38 }
 0x1a4   : > { %295 = vrot.lane.b32.xlu1 %v1848_v39, %s1786_s4  ;;  %v291_v57 = vpack.c.bf16 %v288_v54, %v287_v53  ;;  %v434_v54 = vld [vmem:[%s2125_s1 + $0x20] sm:$0x1] }
 0x1a5   : > { %v292_v0 = vpack.c.bf16 %v290_v63, %v289_v62  ;;  %v208_v63 = vand.u32 7, %v1855_v44 }
 0x1a7   : > { %v285_v40 = vpop.f32.mrf.mxu0  ;;  %vm209_vm11 = vcmp.eq.s32.totalorder %v208_v63, %v1852_v42  ;;  %v1626_v42 = vld [vmem:[%s2125_s1 + $0x10] sm:$0xff] }
 0x1a8   : > { %v1906_v44 = vsel %vm209_vm11, 1.0, %v1787_v49 }
 0x216   : > { %v296_v48 = vpop.permute.xlu1 %295 }
 0x217   : > { %v304_v52 = vsel %vm217_vm0, %v296_v48, 0 }
 0x218   : > { %313 = vmatpush.bf16.xpose.msra.mxu1 %v304_v52 }
 0x21f   : > { %1467 = vmatmul.msk.bf16.vlgmr.msra.gmra.mxu1 %vm217_vm0, %v291_v57  ;;  %v447_v57 = vunpack.c.l.b16 %v434_v54 }
 0x221   : > { %v450_v58 = vpack.c.b16 %v447_v57, %v447_v57 }
 0x22f   : > { %1468 = vmatmul.msk.bf16.gmra.mxu1 %vm217_vm0, %v292_v0  ;;  %v462_v0 = vrot.slane %v460_v59, 1 }
 0x29c   : > { %v315_v1 = vpop.f32.mrf.mxu1 }
 0x29d   : > { %v326_v2 = vsel %vm325_vm9, %v315_v1, -inf }
 0x29e   : > { %327 = vmax.xlane.f32.xlu1 %v326_v2  ;;  %v468_v2 = vshll.u32 %v450_v58, 16 }
 0x2a4   : > { %v317_v3 = vpop.f32.mrf.mxu1 }
 0x2a5   : > { %v329_v4 = vsel %vm325_vm9, %v317_v3, -inf }
 0x2a6   : > { %330 = vmax.xlane.f32.xlu2 %v329_v4 }
 0x2ac   : > { %v320_v5 = vpop.f32.mrf.mxu1 }
 0x2ad   : > { %v332_v6 = vsel %vm325_vm9, %v320_v5, -inf }
 0x2ae   : > { %333 = vmax.xlane.f32.xlu2 %v332_v6  ;;  %v470_v6 = vrot.slane %v468_v2, 1 }
 0x2b4   : > { %v322_v7 = vpop.f32.mrf.mxu1 }
 0x2b5   : > { %v335_v8 = vsel %vm325_vm9, %v322_v7, -inf }
 0x2b6   : > { %336 = vmax.xlane.f32.xlu0 %v335_v8 }
 0x311   : > { %v328_v9 = vpop.xlane.xlu1 %327 }
 0x312   : > { %v338_v11 = vsub.f32 %v315_v1, %v328_v9  ;;  %v464_v1 = vshrl.u32 %v1627_v56, 16 }
 0x314   : > { %v342_v12 = vmul.f32 1.442695, %v338_v11  ;;  %v455_v11 = vshll.u32 %v1626_v42, 16 }
 0x316   : > { %1694 = vpow2.f32 %v342_v12  ;;  %v453_v12 = vshrl.u32 %v1626_v42, 16 }
 0x319   : > { %v331_v13 = vpop.xlane.xlu2 %330 }
 0x31a   : > { %v339_v14 = vsub.f32 %v317_v3, %v331_v13  ;;  %v457_v13 = vrot.slane %v455_v11, 1  ;;  %v1680_v11 = vld [vmem:[#allocation2 + $0xb] ss:$0 sm:$0xff] }
 0x31c   : > { %v1695_v15 = vpop.eup %1694  ;;  %v344_v16 = vmul.f32 1.442695, %v339_v14  ;;  %v458_v14 = vor.u32 %v457_v13, %v453_v12 }
 0x31d   : > { %v350_v17 = vsel %vm325_vm9, %v1695_v15, 0.0 }
 0x31e   : > { %1696 = vpow2.f32 %v344_v16  ;;  %351 = vadd.xlane.f32.xlu2 %v350_v17  ;;  %v435_v17 = vunpack.c.l.bf16 %v434_v54 }
 0x321   : > { %v334_v18 = vpop.xlane.xlu2 %333 }
 0x322   : > { %v340_v19 = vsub.f32 %v320_v5, %v334_v18  ;;  %v466_v5 = vor.u32 %v464_v1, %v462_v0  ;;  %v437_v18 = vperm.slane %v435_v17, 1 }
 0x324   : > { %v1697_v20 = vpop.eup %1696  ;;  %v346_v21 = vmul.f32 1.442695, %v340_v19  ;;  %v471_v9 = vsel %vm451_vm12, %v466_v5, %v470_v6 }
 0x325   : > { %v353_v22 = vsel %vm325_vm9, %v1697_v20, 0.0 }
 0x326   : > { %1698 = vpow2.f32 %v346_v21  ;;  %354 = vadd.xlane.f32.xlu0 %v353_v22 }
 0x329   : > { %v337_v23 = vpop.xlane.xlu0 %336 }
 0x32a   : > { %v341_v24 = vsub.f32 %v322_v7, %v337_v23 }
 0x32c   : > { %v1699_v25 = vpop.eup %1698  ;;  %v348_v26 = vmul.f32 1.442695, %v341_v24 }
 0x32d   : > { %v356_v27 = vsel %vm325_vm9, %v1699_v25, 0.0 }
 0x32e   : > { %1700 = vpow2.f32 %v348_v26  ;;  %357 = vadd.xlane.f32.xlu0 %v356_v27 }
 0x334   : > { %v1701_v28 = vpop.eup %1700 }
 0x335   : > { %v359_v29 = vsel %vm325_vm9, %v1701_v28, 0.0 }
 0x336   : > { %372 = vrot.lane.b32.xlu2 %v1848_v39, %s1788_s5  ;;  %360 = vadd.xlane.f32.xlu0 %v359_v29  ;;  %v525_v29 = vld [vmem:[%s2125_s1 + $0x30] sm:$0x1] }
 0x391   : > { %v352_v30 = vpop.xlane.xlu2 %351 }
 0x392   : > { %1702 = vrcp.f32 %v352_v30  ;;  %v539_v30 = vunpack.c.l.b16 %v525_v29 }
 0x398   : > { %v1703_v35 = vpop.eup %1702 }
 0x399   : > { %v373_v31 = vpop.permute.xlu2 %372  ;;  %v355_v33 = vpop.xlane.xlu0 %354  ;;  %v366_v38 = vmul.f32 %v1703_v35, %v1695_v15  ;;  %v463_v15 = vsel %vm451_vm12, %v458_v14, %v462_v0  ;;  %v1483_v35 = vld [vmem:[%s2125_s1 + $0x20] sm:$0xe] }
 0x39a   : > { %1704 = vrcp.f32 %v355_v33  ;;  %v382_v34 = vsel %vm380_vm10, %v373_v31, 0  ;;  %v542_v31 = vpack.c.b16 %v539_v30, %v539_v30 }
 0x39b   : > { %391 = vmatpush.bf16.msra.mxu2 %v382_v34 }
 0x39c   : > { %v547_v34 = vrot.slane %v542_v31, 1 }
 0x3a0   : > { %v1705_v36 = vpop.eup %1704 }
 0x3a1   : > { %v358_v37 = vpop.xlane.xlu0 %357  ;;  %v367_v40 = vmul.f32 %v1705_v36, %v1697_v20  ;;  %v1628_v36 = vld [vmem:[%s2125_s1 + $0x20] sm:$0xf0] }
 0x3a2   : > { %1706 = vrcp.f32 %v358_v37 }
 0x3a3   : > { %v370_v41 = vpack.c.bf16 %v367_v40, %v366_v38  ;;  %v1484_v38 = vor.u32 %v1628_v36, %v1483_v35 }
 0x3a5   : > { %1469 = vmatmul.msk.bf16.vlgmr.msra.gmra.mxu2 %vm325_vm9, %v370_v41  ;;  %v544_v40 = vrot.slane %v1484_v38, 1 }
 0x3a8   : > { %v1707_v43 = vpop.eup %1706 }
 0x3a9   : > { %v361_v39 = vpop.xlane.xlu0 %360  ;;  %v368_v46 = vmul.f32 %v1707_v43, %v1699_v25  ;;  %v592_v43 = vld [vmem:[%s2125_s1 + $0x70] sm:$0x3] }
 0x3aa   : > { %1708 = vrcp.f32 %v361_v39  ;;  %v1637_v39 = vld [vmem:[%s2125_s1 + $0x68] sm:$0xff] }
 0x3b0   : > { %v1709_v45 = vpop.eup %1708 }
 0x3b1   : > { %v369_v47 = vmul.f32 %v1709_v45, %v1701_v28 }
 0x3b3   : > { %v371_v48 = vpack.c.bf16 %v369_v47, %v368_v46  ;;  %v630_v46 = vunpack.c.l.b16 %v592_v43 }
 0x3b5   : > { %1470 = vmatmul.msk.bf16.gmra.mxu2 %vm325_vm9, %v371_v48  ;;  %v704_v48 = vshrl.u32 %v1637_v39, 16 }
 0x428   : > { %v393_v52 = vpop.f32.mrf.mxu2 }
 0x429   : > { %v403_v8 = vmul.f32 %v1860_v50, %v393_v52  ;;  %v707_v52 = vshll.u32 %v1637_v39, 16 }
 0x42b   : > { %v709_v56 = vrot.slane %v707_v52, 2 }
 0x430   : > { %v395_v53 = vpop.f32.mrf.mxu2 }
 0x431   : > { %v404_v7 = vmul.f32 %v1863_v51, %v395_v53  ;;  %v639_v53 = vpack.c.b16 %v630_v46, %v630_v46  ;;  %v1631_v46 = vld [vmem:[%s2125_s1 + $0x38] sm:$0xff] }
 0x433   : > { %v713_v57 = vshrl.u32 %v639_v53, 16  ;;  %v716_v58 = vshll.u32 %v639_v53, 16 }
 0x435   : > { %v718_v63 = vrot.slane %v716_v58, 2 }
 0x438   : > { %v398_v55 = vpop.f32.mrf.mxu2 }
 0x439   : > { %v405_v4 = vmul.f32 %v1872_v60, %v398_v55  ;;  %v706_v55 = vrot.slane %v704_v48, 1  ;;  %v1630_v48 = vld [vmem:[%s2125_s1 + $0x30] sm:$0xf0] }
 0x43b   : > { %v710_v59 = vor.u32 %v709_v56, %v706_v55  ;;  %v650_v55 = vshrl.u32 %v1631_v46, 16  ;;  %v653_v56 = vshll.u32 %v1631_v46, 16 }
 0x440   : > { %v400_v62 = vpop.f32.mrf.mxu2 }
 0x441   : > { %v406_v3 = vmul.f32 %v1875_v61, %v400_v62  ;;  %v715_v62 = vrot.slane %v713_v57, 1 }
 0x443   : > { %422 = vmatpush.msra.mxu3 %v406_v3  ;;  %v719_v0 = vor.u32 %v718_v63, %v715_v62  ;;  %v655_v62 = vrot.slane %v653_v56, 2 }
 0x445   : > { %423 = vmatpush.msra.mxu3 %v405_v4  ;;  %v720_v1 = vsel %vm640_vm14, %v710_v59, %v719_v0 }
 0x446   : > { %729 = vmatpush.bf16.msrb.mxu2 %v720_v1 }
 0x447   : > { %424 = vmatpush.msra.mxu3 %v404_v7 }
 0x449   : > { %425 = vmatpush.msra.mxu3 %v403_v8  ;;  %v1679_v8 = vld [vmem:[#allocation2 + $0xa] ss:$0 sm:$0xff] }
 0x44a   : > { %1471 = vmatmul.msk.f32.vlgmr.msra.gmra.mxu3 %vm217_vm0, %v1906_v44 }
 0x44b   : > { %483 = vmatpush.bf16.msrb.mxu3 %v471_v9 }
 0x44f   : > { %484 = vmatpush.bf16.msrb.mxu3 %v463_v15  ;;  %v1636_v15 = vld [vmem:[%s2125_s1 + $0x60] sm:$0xff] }
 0x4cd   : > { %v427_v49 = vpop.f32.mrf.mxu3 }
 0x4ce   : > { %v436_v16 = vpack.c.bf16 %v427_v49, %v427_v49  ;;  %v695_v49 = vshrl.u32 %v1636_v15, 16 }
 0x4d0   : > { %1480 = vmatmul.msk.bf16.vlgmr.msrb.gmra.mxu3 %vm217_vm0, %v436_v16  ;;  %v698_v16 = vshll.u32 %v1636_v15, 16  ;;  %v697_v17 = vrot.slane %v695_v49, 1 }
 0x553   : > { %v486_v19 = vpop.f32.mrf.mxu3 }
 0x554   : > { %v487_v20 = vadd.f32 %v486_v19, %v437_v18  ;;  %v700_v18 = vrot.slane %v698_v16, 2  ;;  %v1635_v19 = vld [vmem:[%s2125_s1 + $0x58] sm:$0xff] }
 0x556   : > { %v494_v21 = vadd.f32 %v487_v20, %v1840_v32  ;;  %v1629_v32 = vld [vmem:[%s2125_s1 + $0x28] sm:$0xff]  ;;  %v701_v20 = vor.u32 %v700_v18, %v697_v17 }
 0x557   : > { %v545_v33 = vrot.slane %v1629_v32, 1 }
 0x558   : > { %v495_v22 = vsel %vm217_vm0, %v494_v21, 0.0 }
 0x559   : > { %496 = vadd.xlane.f32.xlu0 %v495_v22  ;;  %v548_v37 = vsel %vm543_vm13, %v545_v33, %v547_v34  ;;  %v546_v41 = vsel %vm543_vm13, %v544_v40, %v545_v33  ;;  %v689_v22 = vshll.u32 %v1635_v19, 16  ;;  %v1633_v33 = vld [vmem:[%s2125_s1 + $0x48] sm:$0xff] }
 0x55a   : > { %560 = vmatpush.bf16.msrb.mxu0 %v548_v37  ;;  %v668_v35 = vshrl.u32 %v1633_v33, 16  ;;  %v671_v36 = vshll.u32 %v1633_v33, 16 }
 0x55b   : > { %v488_v23 = vpop.f32.mrf.mxu3 }
 0x55c   : > { %v711_v23 = vsel %vm640_vm14, %v701_v20, %v710_v59  ;;  %v670_v38 = vrot.slane %v668_v35, 1  ;;  %v673_v40 = vrot.slane %v671_v36, 2  ;;  %v652_v59 = vrot.slane %v650_v55, 1 }
 0x55d   : > { %730 = vmatpush.bf16.msrb.mxu2 %v711_v23 }
 0x55e   : > { %561 = vmatpush.bf16.msrb.mxu0 %v546_v41  ;;  %v1632_v41 = vld [vmem:[%s2125_s1 + $0x40] sm:$0xff]  ;;  %v674_v39 = vor.u32 %v673_v40, %v670_v38 }
 0x55f   : > { %v659_v43 = vshrl.u32 %v1632_v41, 16 }
 0x561   : > { %v661_v53 = vrot.slane %v659_v43, 1 }
 0x5cc   : > { %v497_v24 = vpop.xlane.xlu0 %496 }
 0x5cd   : > { %v498_v25 = vmul.f32 %v497_v24, %v1829_v10 }
 0x5cf   : > { %v499_v26 = vsub.f32 %v494_v21, %v498_v25  ;;  %v686_v21 = vshrl.u32 %v1635_v19, 16  ;;  %v691_v25 = vrot.slane %v689_v22, 2 }
 0x5d1   : > { %v500_v27 = vmul.f32 %v499_v26, %v499_v26  ;;  %v688_v24 = vrot.slane %v686_v21, 1 }
 0x5d3   : > { %v501_v28 = vsel %vm217_vm0, %v500_v27, 0.0  ;;  %v692_v27 = vor.u32 %v691_v25, %v688_v24  ;;  %v593_v24 = vld [vmem:[%s2125_s1 + $0x70] sm:$0x2] }
 0x5d4   : > { %502 = vadd.xlane.f32.xlu2 %v501_v28  ;;  %v594_v25 = vunpack.c.l.bf16 %v593_v24 }
 0x5d5   : > { %v702_v30 = vsel %vm640_vm14, %v692_v27, %v701_v20 }
 0x5d6   : > { %731 = vmatpush.bf16.msrb.mxu2 %v702_v30 }
 0x647   : > { %v503_v45 = vpop.xlane.xlu2 %502 }
 0x648   : > { %v504_v47 = vmul.f32 %v503_v45, %v1829_v10  ;;  %v662_v45 = vshll.u32 %v1632_v41, 16 }
 0x64a   : > { %v505_v54 = vadd.f32 1e-12, %v504_v47  ;;  %v1492_v47 = vld [vmem:[%s2125_s1 + $0x30] sm:$0xe] }
 0x64b   : > { %v1493_v57 = vor.u32 %v1630_v48, %v1492_v47 }
 0x64c   : > { %1710 = vrsqrt.f32 %v505_v54  ;;  %vm512_vm1 = vweird.f32 %v505_v54 }
 0x64d   : > { %v642_v63 = vshrl.u32 %v1493_v57, 16  ;;  %v645_v0 = vshll.u32 %v1493_v57, 16 }
 0x652   : > { %v1711_v2 = vpop.eup %1710 }
 0x653   : > { %v507_v3 = vmul.f32 %v1711_v2, %v505_v54  ;;  %vm513_vm15 = vweird.f32 %v1711_v2  ;;  %v664_v54 = vrot.slane %v662_v45, 2 }
 0x654   : > { %vm514_vm2 = vmor %vm512_vm1, %vm513_vm15 }
 0x655   : > { %v508_v4 = vmul.f32 %v1711_v2, %v507_v3  ;;  %v665_v58 = vor.u32 %v664_v54, %v661_v53  ;;  %v644_v3 = vrot.slane %v642_v63, 1  ;;  %v1682_v54 = vld [vmem:[#allocation2 + $0xd] ss:$0 sm:$0xff] }
 0x657   : > { %v509_v5 = vmul.f32 0.5, %v508_v4  ;;  %v675_v1 = vsel %vm640_vm14, %v665_v58, %v674_v39  ;;  %v647_v4 = vrot.slane %v645_v0, 2 }
 0x659   : > { %v510_v6 = vsub.f32 1.5, %v509_v5 }
 0x65b   : > { %v511_v7 = vmul.f32 %v1711_v2, %v510_v6  ;;  %v648_v6 = vor.u32 %v647_v4, %v644_v3 }
 0x65d   : > { %v515_v9 = vsel %vm514_vm2, %v1711_v2, %v511_v7  ;;  %v656_v2 = vor.u32 %v655_v62, %v652_v59  ;;  %v526_v7 = vld [vmem:[%s2125_s1 + $0x30] sm:$0x2]  ;;  %v1526_v59 = vld [vmem:[%s2125_s1 + $0x84] sm:$0x1] }
 0x65e   : > { %v516_v42 = vmul.f32 %v515_v9, %v499_v26  ;;  %v1634_v26 = vld [vmem:[%s2125_s1 + $0x50] sm:$0xff]  ;;  %v527_v9 = vunpack.c.l.bf16 %v526_v7  ;;  %v776_v62 = vunpack.c.l.bf16 %v1526_v59 }
 0x65f   : > { %v677_v28 = vshrl.u32 %v1634_v26, 16  ;;  %v680_v29 = vshll.u32 %v1634_v26, 16  ;;  %v666_v5 = vsel %vm640_vm14, %v656_v2, %v665_v58  ;;  %v596_v26 = vperm.slane %v594_v25, 3 }
 0x660   : > { %v518_v12 = vmul.f32 %v1679_v8, %v516_v42  ;;  %v657_v8 = vsel %vm640_vm14, %v648_v6, %v656_v2  ;;  %v529_v42 = vperm.slane %v527_v9, 2  ;;  %v777_v63 = vperm.slane %v776_v62, 0 }
 0x661   : > { %v679_v32 = vrot.slane %v677_v28, 1  ;;  %v682_v31 = vrot.slane %v680_v29, 2 }
 0x662   : > { %v1942_v13 = vadd.f32 %v1680_v11, %v518_v12 }
 0x663   : > { %v683_v34 = vor.u32 %v682_v31, %v679_v32 }
 0x664   : > { %v528_v14 = vpack.c.bf16 %v1942_v13, %v1942_v13 }
 0x665   : > { %v693_v37 = vsel %vm640_vm14, %v683_v34, %v692_v27  ;;  %v684_v52 = vsel %vm640_vm14, %v674_v39, %v683_v34 }
 0x666   : > { %1489 = vmatmul.msk.bf16.vlgmr.msrb.gmra.mxu0 %vm217_vm0, %v528_v14  ;;  %732 = vmatpush.bf16.msrb.mxu2 %v693_v37  ;;  %v1639_v37 = vld [vmem:[%s2125_s1 + $0x7c] sm:$0xff] }
 0x667   : > { %799 = vmatpush.bf16.msra.mxu3 %v1639_v37 }
 0x66a   : > { %733 = vmatpush.bf16.msrb.mxu2 %v684_v52  ;;  %v1681_v52 = vld [vmem:[#allocation2 + $0xc] ss:$0 sm:$0xff] }
 0x66e   : > { %734 = vmatpush.bf16.msrb.mxu2 %v675_v1 }
 0x672   : > { %735 = vmatpush.bf16.msrb.mxu2 %v666_v5 }
 0x676   : > { %736 = vmatpush.bf16.msrb.mxu2 %v657_v8 }
 0x6e3   : > { %v563_v11 = vpop.f32.mrf.mxu0 }
 0x6e4   : > { %v564_v12 = vadd.f32 %v563_v11, %v529_v42 }
 0x6e6   : > { %v567_v14 = vmul.f32 %v564_v12, %v564_v12 }
 0x6e8   : > { %v568_v15 = vmul.f32 %v567_v14, %v564_v12 }
 0x6ea   : > { %v569_v49 = vmul.f32 0.044715, %v568_v15 }
 0x6eb   : > { %v565_v16 = vpop.f32.mrf.mxu0 }
 0x6ec   : > { %v570_v17 = vadd.f32 %v569_v49, %v564_v12 }
 0x6ee   : > { %v571_v18 = vmul.f32 0.7978846, %v570_v17 }
 0x6f0   : > { %1712 = vtanh.f32 %v571_v18 }
 0x6f6   : > { %v1713_v19 = vpop.eup %1712 }
 0x6f7   : > { %v573_v20 = vadd.f32 1.0, %v1713_v19 }
 0x6f9   : > { %v574_v21 = vmul.f32 0.5, %v573_v20 }
 0x6fb   : > { %v575_v22 = vmul.f32 %v574_v21, %v564_v12 }
 0x6fd   : > { %v595_v23 = vpack.c.bf16 %v575_v22, %v575_v22 }
 0x6ff   : > { %737 = vmatmul.bf16.vlgmr.msrb.gmra.mxu2 %v595_v23 }
 0x782   : > { %v738_v27 = vpop.f32.mrf.mxu2 }
 0x783   : > { %v739_v28 = vadd.f32 %v738_v27, %v596_v26 }
 0x785   : > { %v742_v29 = vadd.f32 %v739_v28, %v1942_v13  ;;  %v1638_v13 = vld [vmem:[%s2125_s1 + $0x74] sm:$0xff] }
 0x786   : > { %800 = vmatpush.bf16.msra.mxu3 %v1638_v13 }
 0x787   : > { %v743_v30 = vsel %vm217_vm0, %v742_v29, 0.0 }
 0x788   : > { %744 = vadd.xlane.f32.xlu1 %v743_v30 }
 0x78a   : > { %v740_v32 = vpop.f32.mrf.mxu2 }
 0x7fb   : > { %v745_v31 = vpop.xlane.xlu1 %744 }
 0x7fc   : > { %v746_v33 = vmul.f32 %v745_v31, %v1829_v10 }
 0x7fe   : > { %v747_v34 = vsub.f32 %v742_v29, %v746_v33 }
 0x800   : > { %v748_v35 = vmul.f32 %v747_v34, %v747_v34 }
 0x802   : > { %v749_v36 = vsel %vm217_vm0, %v748_v35, 0.0 }
 0x803   : > { %750 = vadd.xlane.f32.xlu0 %v749_v36 }
 0x876   : > { %v751_v38 = vpop.xlane.xlu0 %750 }
 0x877   : > { %v752_v40 = vmul.f32 %v751_v38, %v1829_v10 }
 0x879   : > { %v753_v41 = vadd.f32 1e-12, %v752_v40 }
 0x87b   : > { %1714 = vrsqrt.f32 %v753_v41  ;;  %vm760_vm4 = vweird.f32 %v753_v41 }
 0x881   : > { %v1715_v39 = vpop.eup %1714 }
 0x882   : > { %v755_v43 = vmul.f32 %v1715_v39, %v753_v41  ;;  %vm761_vm3 = vweird.f32 %v1715_v39 }
 0x883   : > { %vm762_vm5 = vmor %vm760_vm4, %vm761_vm3 }
 0x884   : > { %v756_v45 = vmul.f32 %v1715_v39, %v755_v43 }
 0x886   : > { %v757_v46 = vmul.f32 0.5, %v756_v45 }
 0x888   : > { %v758_v47 = vsub.f32 1.5, %v757_v46 }
 0x88a   : > { %v759_v48 = vmul.f32 %v1715_v39, %v758_v47 }
 0x88c   : > { %v763_v53 = vsel %vm762_vm5, %v1715_v39, %v759_v48 }
 0x88d   : > { %v764_v55 = vmul.f32 %v763_v53, %v747_v34 }
 0x88f   : > { %v766_v56 = vmul.f32 %v1681_v52, %v764_v55 }
 0x891   : > { %v1995_v57 = vadd.f32 %v1682_v54, %v766_v56 }
 0x893   : > { %v769_v58 = vpack.c.bf16 %v1995_v57, %v1995_v57 }
 0x895   : > { %1535 = vmatmul.msk.bf16.vlgmr.msra.gmra.mxu3 %vm217_vm0, %v769_v58 }
 0x918   : > { %v802_v0 = vpop.f32.mrf.mxu3 }
 0x919   : > { %v803_v1 = vadd.f32 %v802_v0, %v777_v63 }
 0x91b   : > { %v812_v2 = vpack.c.bf16 %v803_v1, %v803_v1  ;;  %v806_v6 = vmul.f32 %v1860_v50, %v803_v1  ;;  %v807_v7 = vmul.f32 %v1863_v51, %v803_v1  ;;  %v808_v9 = vmul.f32 %v1872_v60, %v803_v1 }
 0x91c   : > { %v809_v42 = vmul.f32 %v1875_v61, %v803_v1  ;;  %v1545_v1 = vld [vmem:[%s2125_s1 + $0x94] sm:$0x1] }
 0x91d   : > { %814 = vrot.lane.b32.xlu1 %v812_v2, %s1786_s4  ;;  %v810_v8 = vpack.c.bf16 %v807_v7, %v806_v6 }
 0x91e   : > { %v811_v11 = vpack.c.bf16 %v809_v42, %v808_v9 }
 0x920   : > { %v804_v3 = vpop.f32.mrf.mxu3 }
 0x921   : > { %v1641_v3 = vld [vmem:[%s2125_s1 + $0x8c] sm:$0xff] }
 0x922   : > { %v973_v6 = vshll.u32 %v1641_v3, 16  ;;  %v977_v9 = vshrl.u32 %v1641_v3, 16 }
 0x98f   : > { %v815_v4 = vpop.permute.xlu1 %814 }
 0x990   : > { %v823_v5 = vsel %vm217_vm0, %v815_v4, 0  ;;  %v961_v4 = vunpack.c.l.b16 %v1545_v1 }
 0x991   : > { %832 = vmatpush.bf16.xpose.msra.mxu0 %v823_v5 }
 0x992   : > { %v964_v5 = vpack.c.b16 %v961_v4, %v961_v4 }
 0x994   : > { %v981_v42 = vshll.u32 %v964_v5, 16 }
 0x998   : > { %1536 = vmatmul.msk.bf16.vlgmr.msra.gmra.mxu0 %vm217_vm0, %v810_v8  ;;  %v975_v8 = vrot.slane %v973_v6, 1 }
 0x9a8   : > { %1537 = vmatmul.msk.bf16.gmra.mxu0 %vm217_vm0, %v811_v11 }
 0xa15   : > { %v834_v12 = vpop.f32.mrf.mxu0 }
 0xa16   : > { %v844_v14 = vsel %vm325_vm9, %v834_v12, -inf }
 0xa17   : > { %845 = vmax.xlane.f32.xlu0 %v844_v14  ;;  %v979_v14 = vor.u32 %v977_v9, %v975_v8 }
 0xa1d   : > { %v836_v15 = vpop.f32.mrf.mxu0 }
 0xa1e   : > { %v847_v49 = vsel %vm325_vm9, %v836_v15, -inf }
 0xa1f   : > { %848 = vmax.xlane.f32.xlu0 %v847_v49 }
 0xa25   : > { %v839_v16 = vpop.f32.mrf.mxu0 }
 0xa26   : > { %v850_v17 = vsel %vm325_vm9, %v839_v16, -inf }
 0xa27   : > { %851 = vmax.xlane.f32.xlu0 %v850_v17 }
 0xa2d   : > { %v841_v18 = vpop.f32.mrf.mxu0 }
 0xa2e   : > { %v853_v19 = vsel %vm325_vm9, %v841_v18, -inf }
 0xa2f   : > { %854 = vmax.xlane.f32.xlu1 %v853_v19 }
 0xa8a   : > { %v846_v20 = vpop.xlane.xlu0 %845 }
 0xa8b   : > { %v856_v21 = vsub.f32 %v834_v12, %v846_v20 }
 0xa8d   : > { %v860_v22 = vmul.f32 1.442695, %v856_v21 }
 0xa8f   : > { %1716 = vpow2.f32 %v860_v22  ;;  %v949_v22 = vunpack.c.l.bf16 %v1545_v1 }
 0xa92   : > { %v849_v23 = vpop.xlane.xlu0 %848 }
 0xa93   : > { %v857_v24 = vsub.f32 %v836_v15, %v849_v23  ;;  %v983_v15 = vrot.slane %v981_v42, 1  ;;  %v951_v23 = vperm.slane %v949_v22, 1 }
 0xa95   : > { %v1717_v25 = vpop.eup %1716  ;;  %v862_v26 = vmul.f32 1.442695, %v857_v24  ;;  %v984_v17 = vsel %vm451_vm12, %v979_v14, %v983_v15  ;;  %v1684_v14 = vld [vmem:[#allocation2 + $0xf] ss:$0 sm:$0xff] }
 0xa96   : > { %v868_v27 = vsel %vm325_vm9, %v1717_v25, 0.0 }
 0xa97   : > { %1718 = vpow2.f32 %v862_v26  ;;  %869 = vadd.xlane.f32.xlu0 %v868_v27 }
 0xa9a   : > { %v852_v28 = vpop.xlane.xlu0 %851 }
 0xa9b   : > { %v858_v29 = vsub.f32 %v839_v16, %v852_v28 }
 0xa9d   : > { %v1719_v30 = vpop.eup %1718  ;;  %v864_v32 = vmul.f32 1.442695, %v858_v29 }
 0xa9e   : > { %v871_v31 = vsel %vm325_vm9, %v1719_v30, 0.0 }
 0xa9f   : > { %1720 = vpow2.f32 %v864_v32  ;;  %872 = vadd.xlane.f32.xlu2 %v871_v31 }
 0xaa2   : > { %v855_v33 = vpop.xlane.xlu1 %854 }
 0xaa3   : > { %v859_v34 = vsub.f32 %v841_v18, %v855_v33  ;;  %v1559_v33 = vld [vmem:[%s2125_s1 + $0xa4] sm:$0x1] }
 0xaa5   : > { %v1721_v35 = vpop.eup %1720  ;;  %v866_v36 = vmul.f32 1.442695, %v859_v34  ;;  %v1052_v34 = vunpack.c.l.b16 %v1559_v33 }
 0xaa6   : > { %v874_v37 = vsel %vm325_vm9, %v1721_v35, 0.0 }
 0xaa7   : > { %1722 = vpow2.f32 %v866_v36  ;;  %875 = vadd.xlane.f32.xlu2 %v874_v37 }
 0xaab   : > { %890 = vrot.lane.b32.xlu0 %v812_v2, %s1788_s5 }
 0xaad   : > { %v1723_v13 = vpop.eup %1722 }
 0xaae   : > { %v877_v38 = vsel %vm325_vm9, %v1723_v13, 0.0 }
 0xaaf   : > { %878 = vadd.xlane.f32.xlu2 %v877_v38  ;;  %v1642_v38 = vld [vmem:[%s2125_s1 + $0x94] sm:$0xf0] }
 0xb0a   : > { %v870_v40 = vpop.xlane.xlu0 %869 }
 0xb12   : > { %v873_v41 = vpop.xlane.xlu2 %872 }
 0xb13   : > { %1724 = vrcp.f32 %v873_v41 }
 0xb14   : > { %1726 = vrcp.f32 %v870_v40 }
 0xb19   : > { %v1725_v39 = vpop.eup %1724 }
 0xb1a   : > { %v876_v43 = vpop.xlane.xlu2 %875  ;;  %v1727_v45 = vpop.eup %1726  ;;  %v885_v46 = vmul.f32 %v1725_v39, %v1719_v30 }
 0xb1b   : > { %v884_v48 = vmul.f32 %v1727_v45, %v1717_v25  ;;  %v1651_v45 = vld [vmem:[%s2125_s1 + $0xdc] sm:$0xff] }
 0xb1d   : > { %v891_v47 = vpop.permute.xlu0 %890  ;;  %v888_v53 = vpack.c.bf16 %v885_v46, %v884_v48  ;;  %v1586_v46 = vld [vmem:[%s2125_s1 + $0xe4] sm:$0x3] }
 0xb1e   : > { %v899_v52 = vsel %vm380_vm10, %v891_v47, 0  ;;  %v1142_v48 = vunpack.c.l.b16 %v1586_v46  ;;  %v1645_v46 = vld [vmem:[%s2125_s1 + $0xac] sm:$0xff] }
 0xb1f   : > { %908 = vmatpush.bf16.msrb.mxu1 %v899_v52 }
 0xb22   : > { %1538 = vmatmul.msk.bf16.vlgmr.msrb.gmra.mxu1 %vm325_vm9, %v888_v53  ;;  %v879_v54 = vpop.xlane.xlu2 %878  ;;  %v1215_v53 = vshrl.u32 %v1651_v45, 16 }
 0xb23   : > { %1728 = vrcp.f32 %v879_v54  ;;  %v1218_v54 = vshll.u32 %v1651_v45, 16 }
 0xb24   : > { %1730 = vrcp.f32 %v876_v43 }
 0xb29   : > { %v1729_v55 = vpop.eup %1728 }
 0xb2a   : > { %v1731_v56 = vpop.eup %1730  ;;  %v887_v58 = vmul.f32 %v1729_v55, %v1723_v13  ;;  %v1563_v13 = vld [vmem:[%s2125_s1 + $0x94] sm:$0xe]  ;;  %v1151_v55 = vpack.c.b16 %v1142_v48, %v1142_v48  ;;  %v1644_v48 = vld [vmem:[%s2125_s1 + $0xa4] sm:$0xf0] }
 0xb2b   : > { %v886_v59 = vmul.f32 %v1731_v56, %v1721_v35  ;;  %v1055_v35 = vpack.c.b16 %v1052_v34, %v1052_v34  ;;  %v1564_v41 = vor.u32 %v1642_v38, %v1563_v13  ;;  %v1646_v13 = vld [vmem:[%s2125_s1 + $0xb4] sm:$0xff] }
 0xb2d   : > { %v889_v62 = vpack.c.bf16 %v887_v58, %v886_v59  ;;  %v1059_v37 = vrot.slane %v1055_v35, 1  ;;  %v1056_v39 = vrot.slane %v1564_v41, 1  ;;  %v1217_v58 = vrot.slane %v1215_v53, 1 }
 0xb2e   : > { %v1220_v59 = vrot.slane %v1218_v54, 2  ;;  %v1173_v41 = vshll.u32 %v1646_v13, 16  ;;  %v1161_v53 = vshrl.u32 %v1645_v46, 16  ;;  %v1164_v54 = vshll.u32 %v1645_v46, 16  ;;  %v1686_v46 = vld [vmem:[#allocation2 + $0x11] ss:$0 sm:$0xff] }
 0xb30   : > { %v1175_v45 = vrot.slane %v1173_v41, 2 }
 0xb32   : > { %1539 = vmatmul.msk.bf16.gmra.mxu1 %vm325_vm9, %v889_v62  ;;  %v1224_v62 = vshrl.u32 %v1151_v55, 16 }
 0xb34   : > { %v1226_v1 = vrot.slane %v1224_v62, 1 }
 0xb9f   : > { %v910_v63 = vpop.f32.mrf.mxu1 }
 0xba0   : > { %v920_v16 = vmul.f32 %v1860_v50, %v910_v63  ;;  %v1227_v63 = vshll.u32 %v1151_v55, 16 }
 0xba7   : > { %v912_v0 = vpop.f32.mrf.mxu1 }
 0xba8   : > { %v921_v49 = vmul.f32 %v1863_v51, %v912_v0  ;;  %v1221_v0 = vor.u32 %v1220_v59, %v1217_v58  ;;  %v1163_v58 = vrot.slane %v1161_v53, 1  ;;  %v1166_v59 = vrot.slane %v1164_v54, 2  ;;  %v1311_v53 = vld [vmem:[#allocation2 + $0x3b] sm:$0xff]  ;;  %v1310_v54 = vld [vmem:[#allocation2 + $0x33] sm:$0xff] }
 0xbaf   : > { %v915_v2 = vpop.f32.mrf.mxu1 }
 0xbb0   : > { %v922_v12 = vmul.f32 %v1872_v60, %v915_v2  ;;  %v1640_v60 = vld [vmem:[%s2125_s1 + $0x84] sm:$0xff]  ;;  %v1229_v2 = vrot.slane %v1227_v63, 2 }
 0xbb1   : > { %v966_v18 = vshrl.u32 %v1640_v60, 16 }
 0xbb2   : > { %v1230_v3 = vor.u32 %v1229_v2, %v1226_v1 }
 0xbb4   : > { %v1231_v4 = vsel %vm640_vm14, %v1221_v0, %v1230_v3 }
 0xbb5   : > { %1240 = vmatpush.bf16.msrb.mxu0 %v1231_v4  ;;  %v1560_v4 = vld [vmem:[%s2125_s1 + $0xa4] sm:$0x2] }
 0xbb7   : > { %v917_v7 = vpop.f32.mrf.mxu1 }
 0xbb8   : > { %v923_v11 = vmul.f32 %v1875_v61, %v917_v7  ;;  %v968_v61 = vshll.u32 %v1640_v60, 16  ;;  %v1650_v60 = vld [vmem:[%s2125_s1 + $0xd4] sm:$0xff] }
 0xbba   : > { %936 = vmatpush.msra.mxu2 %v923_v11  ;;  %v970_v19 = vrot.slane %v968_v61, 1  ;;  %v1683_v11 = vld [vmem:[#allocation2 + $0xe] ss:$0 sm:$0xff]  ;;  %v1206_v61 = vshrl.u32 %v1650_v60, 16 }
 0xbbc   : > { %937 = vmatpush.msra.mxu2 %v922_v12  ;;  %v971_v20 = vor.u32 %v970_v19, %v966_v18  ;;  %v1209_v18 = vshll.u32 %v1650_v60, 16  ;;  %v1208_v19 = vrot.slane %v1206_v61, 1 }
 0xbbe   : > { %938 = vmatpush.msra.mxu2 %v921_v49  ;;  %v976_v51 = vsel %vm451_vm12, %v971_v20, %v975_v8  ;;  %v1211_v20 = vrot.slane %v1209_v18, 2 }
 0xbc0   : > { %939 = vmatpush.msra.mxu2 %v920_v16 }
 0xbc1   : > { %1540 = vmatmul.msk.f32.vlgmr.msra.gmra.mxu2 %vm217_vm0, %v1906_v44 }
 0xbc2   : > { %996 = vmatpush.bf16.msrb.mxu2 %v984_v17 }
 0xbc6   : > { %997 = vmatpush.bf16.msrb.mxu2 %v976_v51  ;;  %v1649_v51 = vld [vmem:[%s2125_s1 + $0xcc] sm:$0xff] }
 0xbc7   : > { %v1200_v22 = vshll.u32 %v1649_v51, 16 }
 0xc44   : > { %v941_v50 = vpop.f32.mrf.mxu2 }
 0xc45   : > { %v950_v21 = vpack.c.bf16 %v941_v50, %v941_v50  ;;  %v1212_v50 = vor.u32 %v1211_v20, %v1208_v19 }
 0xc47   : > { %1554 = vmatmul.msk.bf16.vlgmr.msrb.gmra.mxu2 %vm217_vm0, %v950_v21  ;;  %v1197_v21 = vshrl.u32 %v1649_v51, 16  ;;  %v1587_v51 = vld [vmem:[%s2125_s1 + $0xe4] sm:$0x2] }
 0xcca   : > { %v999_v24 = vpop.f32.mrf.mxu2 }
 0xccb   : > { %v1000_v44 = vadd.f32 %v999_v24, %v951_v23  ;;  %v1222_v23 = vsel %vm640_vm14, %v1212_v50, %v1221_v0  ;;  %v1199_v24 = vrot.slane %v1197_v21, 1  ;;  %v1167_v0 = vor.u32 %v1166_v59, %v1163_v58  ;;  %v1352_v58 = vld [vmem:[#allocation2 + $0xbc] sm:$0xff]  ;;  %v1351_v59 = vld [vmem:[#allocation2 + $0xb4] sm:$0xff] }
 0xccc   : > { %1241 = vmatpush.bf16.msrb.mxu0 %v1222_v23 }
 0xccd   : > { %v1007_v25 = vadd.f32 %v1000_v44, %v1995_v57  ;;  %v1643_v57 = vld [vmem:[%s2125_s1 + $0x9c] sm:$0xff]  ;;  %v1202_v44 = vrot.slane %v1200_v22, 2 }
 0xcce   : > { %v1057_v36 = vrot.slane %v1643_v57, 1 }
 0xccf   : > { %v1008_v26 = vsel %vm217_vm0, %v1007_v25, 0.0 }
 0xcd0   : > { %1009 = vadd.xlane.f32.xlu2 %v1008_v26  ;;  %v1060_v40 = vsel %vm543_vm13, %v1057_v36, %v1059_v37  ;;  %v1058_v43 = vsel %vm543_vm13, %v1056_v39, %v1057_v36  ;;  %v1203_v26 = vor.u32 %v1202_v44, %v1199_v24 }
 0xcd1   : > { %1072 = vmatpush.bf16.msrb.mxu3 %v1060_v40  ;;  %v1170_v40 = vshrl.u32 %v1646_v13, 16 }
 0xcd2   : > { %v1001_v27 = vpop.f32.mrf.mxu2 }
 0xcd5   : > { %1073 = vmatpush.bf16.msrb.mxu3 %v1058_v43  ;;  %v1172_v43 = vrot.slane %v1170_v40, 1 }
 0xd43   : > { %v1010_v28 = vpop.xlane.xlu2 %1009 }
 0xd44   : > { %v1011_v29 = vmul.f32 %v1010_v28, %v1829_v10 }
 0xd46   : > { %v1012_v30 = vsub.f32 %v1007_v25, %v1011_v29  ;;  %v1648_v25 = vld [vmem:[%s2125_s1 + $0xc4] sm:$0xff]  ;;  %v1213_v29 = vsel %vm640_vm14, %v1203_v26, %v1212_v50  ;;  %v1106_v50 = vunpack.c.l.bf16 %v1587_v51 }
 0xd47   : > { %v1188_v27 = vshrl.u32 %v1648_v25, 16  ;;  %v1191_v28 = vshll.u32 %v1648_v25, 16  ;;  %1242 = vmatpush.bf16.msrb.mxu0 %v1213_v29 }
 0xd48   : > { %v1013_v32 = vmul.f32 %v1012_v30, %v1012_v30  ;;  %v1108_v21 = vperm.slane %v1106_v50, 3 }
 0xd4a   : > { %v1014_v31 = vsel %vm217_vm0, %v1013_v32, 0.0  ;;  %v1193_v32 = vrot.slane %v1191_v28, 2 }
 0xd4b   : > { %1015 = vadd.xlane.f32.xlu0 %v1014_v31  ;;  %v1647_v31 = vld [vmem:[%s2125_s1 + $0xbc] sm:$0xff] }
 0xd4c   : > { %v1179_v34 = vshrl.u32 %v1647_v31, 16  ;;  %v1182_v57 = vshll.u32 %v1647_v31, 16  ;;  %v1282_v31 = vld [vmem:[#allocation2 + $0x22] sm:$0xff] }
 0xd4e   : > { %v1181_v36 = vrot.slane %v1179_v34, 1  ;;  %v1184_v37 = vrot.slane %v1182_v57, 2  ;;  %v1280_v34 = vld [vmem:[#allocation2 + $0x12] sm:$0xff] }
 0xd50   : > { %v1185_v38 = vor.u32 %v1184_v37, %v1181_v36 }
 0xdbe   : > { %v1016_v47 = vpop.xlane.xlu0 %1015 }
 0xdbf   : > { %v1017_v52 = vmul.f32 %v1016_v47, %v1829_v10  ;;  %v1590_v47 = vld [vmem:[%s2125_s1 + $0xa4] sm:$0xe] }
 0xdc0   : > { %v1591_v55 = vor.u32 %v1644_v48, %v1590_v47 }
 0xdc1   : > { %v1018_v56 = vadd.f32 1e-12, %v1017_v52  ;;  %v1176_v52 = vor.u32 %v1175_v45, %v1172_v43 }
 0xdc2   : > { %v1153_v62 = vshrl.u32 %v1591_v55, 16  ;;  %v1156_v63 = vshll.u32 %v1591_v55, 16  ;;  %v1354_v55 = vld [vmem:[#allocation2 + $0xcc] sm:$0xff] }
 0xdc3   : > { %1732 = vrsqrt.f32 %v1018_v56  ;;  %vm1025_vm7 = vweird.f32 %v1018_v56  ;;  %v1177_v3 = vsel %vm640_vm14, %v1167_v0, %v1176_v52  ;;  %1357 = vmatpush.msra.mxu3 %v1354_v55 }
 0xdc4   : > { %v1155_v1 = vrot.slane %v1153_v62, 1  ;;  %v1158_v2 = vrot.slane %v1156_v63, 2  ;;  %v1350_v62 = vld [vmem:[#allocation2 + $0xac] sm:$0xff]  ;;  %v1349_v63 = vld [vmem:[#allocation2 + $0xa4] sm:$0xff] }
 0xdc9   : > { %v1733_v5 = vpop.eup %1732 }
 0xdca   : > { %v1020_v6 = vmul.f32 %v1733_v5, %v1018_v56  ;;  %vm1026_vm6 = vweird.f32 %v1733_v5  ;;  %v1186_v56 = vsel %vm640_vm14, %v1176_v52, %v1185_v38  ;;  %v1312_v52 = vld [vmem:[#allocation2 + $0x43] sm:$0xff] }
 0xdcb   : > { %vm1027_vm8 = vmor %vm1025_vm7, %vm1026_vm6 }
 0xdcc   : > { %v1021_v7 = vmul.f32 %v1733_v5, %v1020_v6 }
 0xdce   : > { %v1022_v8 = vmul.f32 0.5, %v1021_v7  ;;  %v1040_v7 = vunpack.c.l.bf16 %v1560_v4  ;;  %v1344_v4 = vld [vmem:[#allocation2 + $0x7c] sm:$0xff] }
 0xdd0   : > { %v1023_v9 = vsub.f32 1.5, %v1022_v8  ;;  %v1042_v8 = vperm.slane %v1040_v7, 2 }
 0xdd2   : > { %v1024_v42 = vmul.f32 %v1733_v5, %v1023_v9 }
 0xdd4   : > { %v1028_v12 = vsel %vm1027_vm8, %v1733_v5, %v1024_v42  ;;  %v1159_v5 = vor.u32 %v1158_v2, %v1155_v1  ;;  %v1347_v1 = vld [vmem:[#allocation2 + $0x94] sm:$0xff]  ;;  %v1346_v2 = vld [vmem:[#allocation2 + $0x8c] sm:$0xff] }
 0xdd5   : > { %v1029_v15 = vmul.f32 %v1028_v12, %v1012_v30  ;;  %v1190_v30 = vrot.slane %v1188_v27, 1 }
 0xdd6   : > { %v1168_v6 = vsel %vm640_vm14, %v1159_v5, %v1167_v0  ;;  %v1348_v0 = vld [vmem:[#allocation2 + $0x9c] sm:$0xff]  ;;  %v1687_v5 = vld [vmem:[#allocation2 + $0x32] ss:$0 sm:$0xff] }
 0xdd7   : > { %v1031_v49 = vmul.f32 %v1683_v11, %v1029_v15  ;;  %v1194_v33 = vor.u32 %v1193_v32, %v1190_v30  ;;  %v1283_v32 = vld [vmem:[#allocation2 + $0x2a] sm:$0xff] }
 0xdd8   : > { %1301 = vmatpush.msra.mxu2 %v1283_v32 }
 0xdd9   : > { %v2067_v16 = vadd.f32 %v1684_v14, %v1031_v49  ;;  %v1204_v35 = vsel %vm640_vm14, %v1194_v33, %v1203_v26  ;;  %v1195_v39 = vsel %vm640_vm14, %v1185_v38, %v1194_v33  ;;  %v1281_v33 = vld [vmem:[#allocation2 + $0x1a] sm:$0xff] }
 0xdda   : > { %1243 = vmatpush.bf16.msrb.mxu0 %v1204_v35  ;;  %1302 = vmatpush.msra.mxu2 %v1282_v31 }
 0xddb   : > { %v1041_v17 = vpack.c.bf16 %v2067_v16, %v2067_v16 }
 0xddc   : > { %1303 = vmatpush.msra.mxu2 %v1281_v33 }
 0xddd   : > { %1569 = vmatmul.msk.bf16.vlgmr.msrb.gmra.mxu3 %vm217_vm0, %v1041_v17 }
 0xdde   : > { %1244 = vmatpush.bf16.msrb.mxu0 %v1195_v39  ;;  %1304 = vmatpush.msra.mxu2 %v1280_v34  ;;  %v1685_v39 = vld [vmem:[#allocation2 + $0x10] ss:$0 sm:$0xff] }
 0xde2   : > { %1245 = vmatpush.bf16.msrb.mxu0 %v1186_v56  ;;  %v1353_v56 = vld [vmem:[#allocation2 + $0xc4] sm:$0xff] }
 0xde3   : > { %1358 = vmatpush.msra.mxu3 %v1353_v56 }
 0xde5   : > { %1359 = vmatpush.msra.mxu3 %v1352_v58 }
 0xde6   : > { %1246 = vmatpush.bf16.msrb.mxu0 %v1177_v3  ;;  %v1345_v3 = vld [vmem:[#allocation2 + $0x84] sm:$0xff] }
 0xde7   : > { %1360 = vmatpush.msra.mxu3 %v1351_v59 }
 0xde9   : > { %1361 = vmatpush.msra.mxu3 %v1350_v62 }
 0xdea   : > { %1247 = vmatpush.bf16.msrb.mxu0 %v1168_v6  ;;  %v1343_v6 = vld [vmem:[#allocation2 + $0x74] sm:$0xff] }
 0xdeb   : > { %1362 = vmatpush.msra.mxu3 %v1349_v63 }
 0xded   : > { %1363 = vmatpush.msra.mxu3 %v1348_v0 }
 0xdef   : > { %1364 = vmatpush.msra.mxu3 %v1347_v1 }
 0xdf1   : > { %1365 = vmatpush.msra.mxu3 %v1346_v2 }
 0xdf3   : > { %1366 = vmatpush.msra.mxu3 %v1345_v3 }
 0xdf5   : > { %1367 = vmatpush.msra.mxu3 %v1344_v4 }
 0xdf7   : > { %1368 = vmatpush.msra.mxu3 %v1343_v6 }
 0xe60   : > { %v1075_v9 = vpop.f32.mrf.mxu3 }
 0xe61   : > { %v1076_v42 = vadd.f32 %v1075_v9, %v1042_v8  ;;  %v1342_v8 = vld [vmem:[#allocation2 + $0x6c] sm:$0xff] }
 0xe62   : > { %1369 = vmatpush.msra.mxu3 %v1342_v8 }
 0xe63   : > { %v1079_v11 = vmul.f32 %v1076_v42, %v1076_v42 }
 0xe65   : > { %v1080_v12 = vmul.f32 %v1079_v11, %v1076_v42 }
 0xe67   : > { %v1081_v14 = vmul.f32 0.044715, %v1080_v12  ;;  %v1340_v12 = vld [vmem:[#allocation2 + $0x5c] sm:$0xff] }
 0xe68   : > { %v1077_v15 = vpop.f32.mrf.mxu3 }
 0xe69   : > { %v1082_v49 = vadd.f32 %v1081_v14, %v1076_v42  ;;  %v1339_v14 = vld [vmem:[#allocation2 + $0x54] sm:$0xff]  ;;  %v1688_v15 = vld [vmem:[#allocation2 + $0x53] ss:$0 sm:$0xff] }
 0xe6b   : > { %v1083_v17 = vmul.f32 0.7978846, %v1082_v49 }
 0xe6d   : > { %1734 = vtanh.f32 %v1083_v17 }
 0xe73   : > { %v1735_v60 = vpop.eup %1734 }
 0xe74   : > { %v1085_v61 = vadd.f32 1.0, %v1735_v60  ;;  %v1689_v60 = vld [vmem:[#allocation2 + $0xd4] ss:$0 sm:$0xff] }
 0xe76   : > { %v1086_v18 = vmul.f32 0.5, %v1085_v61 }
 0xe78   : > { %v1087_v19 = vmul.f32 %v1086_v18, %v1076_v42  ;;  %v1341_v42 = vld [vmem:[#allocation2 + $0x64] sm:$0xff] }
 0xe79   : > { %1370 = vmatpush.msra.mxu3 %v1341_v42 }
 0xe7a   : > { %v1107_v20 = vpack.c.bf16 %v1087_v19, %v1087_v19 }
 0xe7b   : > { %1371 = vmatpush.msra.mxu3 %v1340_v12 }
 0xe7c   : > { %1248 = vmatmul.bf16.vlgmr.msrb.gmra.mxu0 %v1107_v20 }
 0xe7d   : > { %1372 = vmatpush.msra.mxu3 %v1339_v14 }
 0xef9   : > { %v1249_v22 = vpop.f32.mrf.mxu0 }
 0xefa   : > { %v1250_v23 = vadd.f32 %v1249_v22, %v1108_v21 }
 0xefc   : > { %v1253_v24 = vadd.f32 %v1250_v23, %v2067_v16 }
 0xefe   : > { %v1254_v44 = vsel %vm217_vm0, %v1253_v24, 0.0 }
 0xeff   : > { %1255 = vadd.xlane.f32.xlu2 %v1254_v44 }
 0xf01   : > { %v1251_v25 = vpop.f32.mrf.mxu0 }
 0xf72   : > { %v1256_v26 = vpop.xlane.xlu2 %1255 }
 0xf73   : > { %v1257_v27 = vmul.f32 %v1256_v26, %v1829_v10 }
 0xf75   : > { %v1258_v28 = vsub.f32 %v1253_v24, %v1257_v27 }
 0xf77   : > { %v1259_v29 = vmul.f32 %v1258_v28, %v1258_v28 }
 0xf79   : > { %v1260_v30 = vsel %vm217_vm0, %v1259_v29, 0.0 }
 0xf7a   : > { %1261 = vadd.xlane.f32.xlu1 %v1260_v30 }
 0xfed   : > { %v1262_v16 = vpop.xlane.xlu1 %1261 }
 0xfee   : > { %v1263_v57 = vmul.f32 %v1262_v16, %v1829_v10  ;;  %v1313_v10 = vld [vmem:[#allocation2 + $0x4b] sm:$0xff] }
 0xfef   : > { %1331 = vmatpush.msra.mxu1 %v1313_v10 }
 0xff0   : > { %v1264_v35 = vadd.f32 1e-12, %v1263_v57 }
 0xff1   : > { %1332 = vmatpush.msra.mxu1 %v1312_v52 }
 0xff2   : > { %1736 = vrsqrt.f32 %v1264_v35  ;;  %vm1271_vm10 = vweird.f32 %v1264_v35 }
 0xff3   : > { %1333 = vmatpush.msra.mxu1 %v1311_v53 }
 0xff5   : > { %1334 = vmatpush.msra.mxu1 %v1310_v54 }
 0xff8   : > { %v1737_v36 = vpop.eup %1736 }
 0xff9   : > { %v1266_v37 = vmul.f32 %v1737_v36, %v1264_v35  ;;  %vm1272_vm9 = vweird.f32 %v1737_v36 }
 0xffa   : > { %vm1273_vm11 = vmor %vm1271_vm10, %vm1272_vm9 }
 0xffb   : > { %v1267_v13 = vmul.f32 %v1737_v36, %v1266_v37 }
 0xffd   : > { %v1268_v38 = vmul.f32 0.5, %v1267_v13 }
 0xfff   : > { %v1269_v40 = vsub.f32 1.5, %v1268_v38 }
0x1001   : > { %v1270_v41 = vmul.f32 %v1737_v36, %v1269_v40 }
0x1003   : > { %v1274_v43 = vsel %vm1273_vm11, %v1737_v36, %v1270_v41 }
0x1004   : > { %v1275_v45 = vmul.f32 %v1274_v43, %v1258_v28 }
0x1006   : > { %v1277_v47 = vmul.f32 %v1685_v39, %v1275_v45 }
0x1008   : > { %v1279_v48 = vadd.f32 %v1686_v46, %v1277_v47 }
0x100a   : > { %1620 = vmatmul.msk.f32.vlgmr.msra.gmra.mxu2 %vm217_vm0, %v1279_v48 }
0x108d   : > { %v1306_v7 = vpop.f32.mrf.mxu2 }
0x108e   : > { %v1307_v9 = vadd.f32 %v1687_v5, %v1306_v7 }
0x1090   : > { %1738 = vtanh.f32 %v1307_v9 }
0x1096   : > { %v1739_v11 = vpop.eup %1738 }
0x1097   : > { %1621 = vmatmul.msk.f32.vlgmr.msra.gmra.mxu1 %vm217_vm0, %v1739_v11 }
0x1114   : > { %v1336_v49 = vpop.f32.mrf.mxu1 }
0x1115   : > { %v1337_v17 = vadd.f32 %v1688_v15, %v1336_v49 }
0x1117   : > { %1373 = vmatmul.f32.vlgmr.msra.gmra.mxu3 %v1337_v17 }
0x119a   : > { %v1374_v61 = vpop.f32.mrf.mxu3 }
0x119b   : > { %v1375_v18 = vadd.f32 %v1689_v60, %v1374_v61 }
0x119d   : > { %v1377_v19 = vadd.f32 %v1375_v18, %v1337_v17 }
0x119f   : > { %1378 = vst [vmem:[%s182_s23] sm:$0xff] %v1377_v19 }
0x11a0 PF: > { %s14_s12 = sadd.s32 1, %s1780_s12  }
0x11a1   : > { %p11_p7 = scmp.ge.s32.totalorder %s14_s12, 4  }
0x11a3   :  { %13 = sbr.rel (!%p11_p7) target bundleno = 1 (0x1), region = 68 }
0x11a8   :  { %1398 = vsyncpa [#allocation3], 1 }
0x11a9   :  { %1400 = vsyncpa [#allocation3 + $0x1], 1 }

</bundles_post_ra>
